<compile_context>
chip_gen: v7x
topology: tpu7x:2x2x1
jax: 0.10.0
libtpu: 0.0.40
codegen_flags: <defaults>
</compile_context>

<pallas_src>
import functools
import math

import numpy as np
import jax
import jax.numpy as jnp
from jax.experimental import pallas as pl
from jax.experimental.pallas import tpu as pltpu


def _ru(x, m):
    return (x + m - 1) // m * m


def _pick(d, cands):
    for c in cands:
        if d % c == 0:
            return c
    return 128


_VMEM_LIMIT = 32 * 1024 * 1024
_CONV_VMEM_LIMIT = 64 * 1024 * 1024   # direct conv keeps the whole (small) padded input resident


def _tiles(Mp, Kp, Np):
    tm = _pick(Mp, (512, 256, 128))
    tn = Np if Np <= 512 else _pick(Np, (512, 256, 128))  # e.g. 384 for C=320 stays one tile
    tk = _pick(Kp, (512, 256, 128))
    return tm, tn, tk


# ---------------------------------------------------------------------------
# Matmul kernels (bias / SiLU / residual fused in the epilogue)
# ---------------------------------------------------------------------------

def _mm_kernel(a_ref, b_ref, bias_ref, o_ref, acc_ref, *, act):
    @pl.when(pl.program_id(2) == 0)
    def _():
        acc_ref[...] = jnp.zeros_like(acc_ref)

    acc_ref[...] += jnp.dot(a_ref[...], b_ref[...], preferred_element_type=jnp.float32)

    @pl.when(pl.program_id(2) == pl.num_programs(2) - 1)
    def _():
        y = acc_ref[...] + bias_ref[...]
        if act == "silu":
            y = y * jax.nn.sigmoid(y)
        o_ref[...] = y.astype(o_ref.dtype)


def _mm_res_kernel(a_ref, b_ref, bias_ref, res_ref, o_ref, acc_ref, *, act):
    @pl.when(pl.program_id(2) == 0)
    def _():
        acc_ref[...] = jnp.zeros_like(acc_ref)

    acc_ref[...] += jnp.dot(a_ref[...], b_ref[...], preferred_element_type=jnp.float32)

    @pl.when(pl.program_id(2) == pl.num_programs(2) - 1)
    def _():
        y = acc_ref[...] + bias_ref[...] + res_ref[...].astype(jnp.float32)
        if act == "silu":
            y = y * jax.nn.sigmoid(y)
        o_ref[...] = y.astype(o_ref.dtype)


@functools.partial(jax.jit, static_argnames=("act",))
def _mm(a, b, bias, res, act):
    M, K = a.shape
    N = b.shape[1]
    Mp, Kp, Np = _ru(M, 128), _ru(K, 128), _ru(N, 128)
    tm, tn, tk = _tiles(Mp, Kp, Np)

    a_p = jnp.pad(a.astype(jnp.bfloat16), ((0, Mp - M), (0, Kp - K)))
    b_p = jnp.pad(b.astype(jnp.bfloat16), ((0, Kp - K), (0, Np - N)))
    bias_p = jnp.pad(bias.astype(jnp.float32), (0, Np - N)).reshape(1, Np)

    in_specs = [
        pl.BlockSpec((tm, tk), lambda i, j, k: (i, k)),
        pl.BlockSpec((tk, tn), lambda i, j, k: (k, j)),
        pl.BlockSpec((1, tn), lambda i, j, k: (0, j)),
    ]
    args = [a_p, b_p, bias_p]
    if res is not None:
        res_p = jnp.pad(res.astype(jnp.bfloat16), ((0, Mp - M), (0, Np - N)))
        in_specs.append(pl.BlockSpec((tm, tn), lambda i, j, k: (i, j)))
        args.append(res_p)
        kernel = functools.partial(_mm_res_kernel, act=act)
    else:
        kernel = functools.partial(_mm_kernel, act=act)

    out = pl.pallas_call(
        kernel,
        grid=(Mp // tm, Np // tn, Kp // tk),
        in_specs=in_specs,
        out_specs=pl.BlockSpec((tm, tn), lambda i, j, k: (i, j)),
        out_shape=jax.ShapeDtypeStruct((Mp, Np), jnp.bfloat16),
        scratch_shapes=[pltpu.VMEM((tm, tn), jnp.float32)],
        compiler_params=pltpu.CompilerParams(
            dimension_semantics=("parallel", "parallel", "arbitrary"),
            vmem_limit_bytes=_VMEM_LIMIT),
    )(*args)
    return out[:M, :N]


def mm(a, b, bias=None, res=None, act="none"):
    """a:(M,K) @ b:(K,N) + bias + optional residual, optional fused SiLU."""
    if bias is None:
        bias = jnp.zeros((b.shape[1],), jnp.float32)
    return _mm(a, b, bias, res, act=act)


# ---------------------------------------------------------------------------
# Fused GEGLU matmul: out = (A@Wx + bx) * gelu(A@Wg + bg)
# ---------------------------------------------------------------------------

def _geglu_mm_kernel(a_ref, bx_ref, bg_ref, biasx_ref, biasg_ref, o_ref, accx_ref, accg_ref):
    @pl.when(pl.program_id(2) == 0)
    def _():
        accx_ref[...] = jnp.zeros_like(accx_ref)
        accg_ref[...] = jnp.zeros_like(accg_ref)

    a = a_ref[...]
    accx_ref[...] += jnp.dot(a, bx_ref[...], preferred_element_type=jnp.float32)
    accg_ref[...] += jnp.dot(a, bg_ref[...], preferred_element_type=jnp.float32)

    @pl.when(pl.program_id(2) == pl.num_programs(2) - 1)
    def _():
        xv = accx_ref[...] + biasx_ref[...]
        g = accg_ref[...] + biasg_ref[...]
        gelu = 0.5 * g * (1.0 + jax.lax.erf(g * 0.7071067811865476))  # exact (erf) GELU
        o_ref[...] = (xv * gelu).astype(o_ref.dtype)


@jax.jit
def _mm_geglu(a, bx, bg, biasx, biasg):
    M, K = a.shape
    N = bx.shape[1]
    Mp, Kp, Np = _ru(M, 128), _ru(K, 128), _ru(N, 128)
    tm, tn, tk = _tiles(Mp, Kp, Np)

    a_p = jnp.pad(a.astype(jnp.bfloat16), ((0, Mp - M), (0, Kp - K)))
    bx_p = jnp.pad(bx.astype(jnp.bfloat16), ((0, Kp - K), (0, Np - N)))
    bg_p = jnp.pad(bg.astype(jnp.bfloat16), ((0, Kp - K), (0, Np - N)))
    biasx_p = jnp.pad(biasx.astype(jnp.float32), (0, Np - N)).reshape(1, Np)
    biasg_p = jnp.pad(biasg.astype(jnp.float32), (0, Np - N)).reshape(1, Np)

    out = pl.pallas_call(
        _geglu_mm_kernel,
        grid=(Mp // tm, Np // tn, Kp // tk),
        in_specs=[pl.BlockSpec((tm, tk), lambda i, j, k: (i, k)),
                  pl.BlockSpec((tk, tn), lambda i, j, k: (k, j)),
                  pl.BlockSpec((tk, tn), lambda i, j, k: (k, j)),
                  pl.BlockSpec((1, tn), lambda i, j, k: (0, j)),
                  pl.BlockSpec((1, tn), lambda i, j, k: (0, j))],
        out_specs=pl.BlockSpec((tm, tn), lambda i, j, k: (i, j)),
        out_shape=jax.ShapeDtypeStruct((Mp, Np), jnp.bfloat16),
        scratch_shapes=[pltpu.VMEM((tm, tn), jnp.float32),
                        pltpu.VMEM((tm, tn), jnp.float32)],
        compiler_params=pltpu.CompilerParams(
            dimension_semantics=("parallel", "parallel", "arbitrary"),
            vmem_limit_bytes=_VMEM_LIMIT),
    )(a_p, bx_p, bg_p, biasx_p, biasg_p)
    return out[:M, :N]


def mm_geglu(x, p):
    return _mm_geglu(x, p["x"]["w"], p["g"]["w"], p["x"]["b"], p["g"]["b"])


# ---------------------------------------------------------------------------
# Direct 3x3 stride-1 conv: 9 shifted matmuls accumulated over an "arbitrary" tap axis.
# Input is presented as a zero-padded "padded-W" flat token array (stride Wp = W + 2), so
# tap (dy, dx) is the constant row offset dy*Wp + dx of the output row index.
# ---------------------------------------------------------------------------

def _conv3x3_kernel(x_ref, w_ref, b_ref, o_ref, acc_ref, *, wp):
    t = pl.program_id(1)

    @pl.when(t == 0)
    def _():
        acc_ref[...] = jnp.zeros_like(acc_ref)

    tm = acc_ref.shape[0]
    row0 = pl.program_id(0) * tm + (t // 3) * wp + (t % 3)
    a = x_ref[pl.ds(row0, tm), :]
    acc_ref[...] += jnp.dot(a, w_ref[0], preferred_element_type=jnp.float32)

    @pl.when(t == pl.num_programs(1) - 1)
    def _():
        o_ref[...] = (acc_ref[...] + b_ref[...]).astype(o_ref.dtype)


@functools.partial(jax.jit, static_argnames=("H", "W"))
def _conv3x3_s1(x_tok, w9, bias, H, W):
    """x_tok: (H*W, Cin) tokens -> (H*W, Cout) tokens.  w9: (9, Cin, Cout)."""
    HW, Cin = x_tok.shape
    Cout = w9.shape[2]
    Wp = W + 2
    M = H * Wp                                   # output rows in padded-W layout (2/W overcompute)
    tm = 128 if M <= 128 else 256
    Mp = _ru(M, tm)
    rows_in = _ru(Mp + 2 * Wp + 2, 8)            # enough rows for the largest tap offset

    xs = x_tok.astype(jnp.bfloat16).reshape(H, W, Cin)
    xf = jnp.pad(xs, ((1, 1), (1, 1), (0, 0))).reshape((H + 2) * Wp, Cin)
    xf = jnp.pad(xf, ((0, rows_in - xf.shape[0]), (0, 0)))

    out = pl.pallas_call(
        functools.partial(_conv3x3_kernel, wp=Wp),
        grid=(Mp // tm, 9),
        in_specs=[pl.BlockSpec((rows_in, Cin), lambda i, t: (0, 0)),   # whole input resident
                  pl.BlockSpec((1, Cin, Cout), lambda i, t: (t, 0, 0)),
                  pl.BlockSpec((1, Cout), lambda i, t: (0, 0))],
        out_specs=pl.BlockSpec((tm, Cout), lambda i, t: (i, 0)),
        out_shape=jax.ShapeDtypeStruct((Mp, Cout), jnp.bfloat16),
        scratch_shapes=[pltpu.VMEM((tm, Cout), jnp.float32)],
        compiler_params=pltpu.CompilerParams(
            dimension_semantics=("parallel", "arbitrary"),
            vmem_limit_bytes=_CONV_VMEM_LIMIT),
    )(xf, w9.astype(jnp.bfloat16), bias.astype(jnp.float32).reshape(1, Cout))

    out = out[:M].reshape(H, Wp, Cout)[:, :W, :]
    return out.reshape(H * W, Cout)


@functools.partial(jax.jit, static_argnames=("H", "W"))
def _im2col_s2(x_tok, H, W):
    """im2col for the 3 stride-2 downsampling convs (k=3, pad=1)."""
    C = x_tok.shape[1]
    Ho = (H - 1) // 2 + 1
    Wo = (W - 1) // 2 + 1
    xs = x_tok.reshape(H, W, C)
    xp = jnp.pad(xs, ((1, 1), (1, 1), (0, 0)))
    cols = []
    for dy in range(3):
        for dx in range(3):
            cols.append(xp[dy:dy + 2 * (Ho - 1) + 1:2, dx:dx + 2 * (Wo - 1) + 1:2, :])
    col = jnp.stack(cols, axis=2)                # (Ho, Wo, 9, C)
    return col.reshape(Ho * Wo, 9 * C)


def conv_layer_fwd(p, x, H, W):
    if p["stride"] == 1:
        return _conv3x3_s1(x, p["w9"], p["b"], H=H, W=W), H, W
    Ho = (H - 1) // 2 + 1
    Wo = (W - 1) // 2 + 1
    cin = x.shape[1]
    col = _im2col_s2(x, H=H, W=W)
    out = mm(col, p["w9"].reshape(9 * cin, p["cout"]), p["b"])
    return out, Ho, Wo


# ---------------------------------------------------------------------------
# GroupNorm in token layout: stats kernel (single-pass sum / sum-sq) + scale/shift(+SiLU) kernel
# ---------------------------------------------------------------------------

def _gn_stats_kernel(x_ref, o_ref):
    @pl.when(pl.program_id(0) == 0)
    def _():
        o_ref[...] = jnp.zeros_like(o_ref)
    x = x_ref[...].astype(jnp.float32)
    o_ref[0:1, :] += jnp.sum(x, axis=0, keepdims=True)
    o_ref[1:2, :] += jnp.sum(x * x, axis=0, keepdims=True)


def _gn_scale_kernel(x_ref, sc_ref, sh_ref, o_ref, *, silu):
    x = x_ref[...].astype(jnp.float32)
    y = x * sc_ref[...] + sh_ref[...]
    if silu:
        y = y * jax.nn.sigmoid(y)
    o_ref[...] = y.astype(o_ref.dtype)


@functools.partial(jax.jit, static_argnames=("eps", "silu", "groups"))
def _groupnorm_tok(x, gamma, beta, eps, silu, groups):
    L, C = x.shape
    Cg = C // groups
    Lp = _ru(L, 128)
    tl = _pick(Lp, (512, 256, 128))
    xp = jnp.pad(x, ((0, Lp - L), (0, 0)))       # zero pad rows -> no effect on sums

    stats = pl.pallas_call(
        _gn_stats_kernel,
        grid=(Lp // tl,),
        in_specs=[pl.BlockSpec((tl, C), lambda i: (i, 0))],
        out_specs=pl.BlockSpec((2, C), lambda i: (0, 0)),
        out_shape=jax.ShapeDtypeStruct((2, C), jnp.float32),
        compiler_params=pltpu.CompilerParams(
            dimension_semantics=("arbitrary",), vmem_limit_bytes=_VMEM_LIMIT),
    )(xp)

    cnt = jnp.float32(L * Cg)
    g = stats.reshape(2, groups, Cg).sum(axis=2)            # (2, G)
    mean = g[0] / cnt
    var = jnp.maximum(g[1] / cnt - mean * mean, 0.0)
    inv = jax.lax.rsqrt(var + eps)
    scale = gamma * jnp.repeat(inv, Cg)                     # (C,)
    shift = beta - jnp.repeat(mean, Cg) * scale             # (C,)

    out = pl.pallas_call(
        functools.partial(_gn_scale_kernel, silu=silu),
        grid=(Lp // tl,),
        in_specs=[pl.BlockSpec((tl, C), lambda i: (i, 0)),
                  pl.BlockSpec((1, C), lambda i: (0, 0)),
                  pl.BlockSpec((1, C), lambda i: (0, 0))],
        out_specs=pl.BlockSpec((tl, C), lambda i: (i, 0)),
        out_shape=jax.ShapeDtypeStruct((Lp, C), x.dtype),
        compiler_params=pltpu.CompilerParams(
            dimension_semantics=("parallel",), vmem_limit_bytes=_VMEM_LIMIT),
    )(xp, scale.reshape(1, C), shift.reshape(1, C))
    return out[:L]


def groupnorm(x, p, eps, silu):
    return _groupnorm_tok(x, p["g"], p["b"], eps=eps, silu=silu, groups=32)


# ---------------------------------------------------------------------------
# LayerNorm — row-tiled (up to 512 rows/block), parallel grid
# ---------------------------------------------------------------------------

def _ln_kernel(x_ref, g_ref, b_ref, o_ref):
    x = x_ref[...].astype(jnp.float32)
    mean = jnp.mean(x, axis=-1, keepdims=True)
    d = x - mean
    var = jnp.mean(d * d, axis=-1, keepdims=True)
    y = d * jax.lax.rsqrt(var + 1e-5)
    o_ref[...] = (y * g_ref[...] + b_ref[...]).astype(o_ref.dtype)


@jax.jit
def _layernorm(x, g, b):
    L, C = x.shape
    Lp = _ru(L, 128)
    tl = _pick(Lp, (512, 256, 128))
    xp = jnp.pad(x, ((0, Lp - L), (0, 0)))
    out = pl.pallas_call(
        _ln_kernel,
        grid=(Lp // tl,),
        in_specs=[pl.BlockSpec((tl, C), lambda i: (i, 0)),
                  pl.BlockSpec((1, C), lambda i: (0, 0)),
                  pl.BlockSpec((1, C), lambda i: (0, 0))],
        out_specs=pl.BlockSpec((tl, C), lambda i: (i, 0)),
        out_shape=jax.ShapeDtypeStruct((Lp, C), x.dtype),
        compiler_params=pltpu.CompilerParams(
            dimension_semantics=("parallel",), vmem_limit_bytes=_VMEM_LIMIT),
    )(xp, g.reshape(1, C), b.reshape(1, C))
    return out[:L]


def layernorm(x, p):
    return _layernorm(x, p["g"], p["b"])


# ---------------------------------------------------------------------------
# Tiny SiLU kernel (used once, on the shared silu(time_embedding) vector)
# ---------------------------------------------------------------------------

def _silu_kernel(x_ref, o_ref):
    x = x_ref[...].astype(jnp.float32)
    o_ref[...] = (x * jax.nn.sigmoid(x)).astype(o_ref.dtype)


@jax.jit
def silu_pallas(x):
    return pl.pallas_call(
        _silu_kernel,
        out_shape=jax.ShapeDtypeStruct(x.shape, x.dtype),
    )(x)


# ---------------------------------------------------------------------------
# Flash attention over per-head-padded (L, heads*128) arrays.
# Heads are addressed purely through the BlockSpec (128-wide column slots); no transposes.
# ---------------------------------------------------------------------------

def _flash_kernel(q_ref, k_ref, v_ref, o_ref, m_ref, l_ref, acc_ref, *,
                  scale, kv_len, tk, need_mask):
    ki = pl.program_id(2)

    @pl.when(ki == 0)
    def _():
        m_ref[...] = jnp.full_like(m_ref, -1e30)
        l_ref[...] = jnp.zeros_like(l_ref)
        acc_ref[...] = jnp.zeros_like(acc_ref)

    q = q_ref[...]
    k = k_ref[...]
    s = jax.lax.dot_general(q, k, (((1,), (1,)), ((), ())),
                            preferred_element_type=jnp.float32) * scale
    if need_mask:
        col = jax.lax.broadcasted_iota(jnp.int32, s.shape, 1) + ki * tk
        s = jnp.where(col < kv_len, s, -1e30)

    m_prev = m_ref[...]
    m_new = jnp.maximum(m_prev, jnp.max(s, axis=-1, keepdims=True))
    alpha = jnp.exp(m_prev - m_new)
    p = jnp.exp(s - m_new)
    l_ref[...] = alpha * l_ref[...] + jnp.sum(p, axis=-1, keepdims=True)
    acc_ref[...] = alpha * acc_ref[...] + jnp.dot(p.astype(v_ref.dtype), v_ref[...],
                                                  preferred_element_type=jnp.float32)
    m_ref[...] = m_new

    @pl.when(ki == pl.num_programs(2) - 1)
    def _():
        o_ref[...] = (acc_ref[...] * pl.reciprocal(l_ref[...], approx=True)).astype(o_ref.dtype)


@functools.partial(jax.jit, static_argnames=("n_heads", "dh", "q_off", "k_off", "v_off"))
def _attention(q, k, v, n_heads, dh, q_off, k_off, v_off):
    """q/k/v: (L, *), head h occupies 128-wide column slot (off + h).  q/k/v may alias."""
    Lq, Lk = q.shape[0], k.shape[0]
    Lqp, Lkp = _ru(Lq, 128), _ru(Lk, 128)
    tq = _pick(Lqp, (512, 256, 128))
    tk = _pick(Lkp, (512, 256, 128))
    qp = jnp.pad(q, ((0, Lqp - Lq), (0, 0)))
    kp = jnp.pad(k, ((0, Lkp - Lk), (0, 0)))
    vp = jnp.pad(v, ((0, Lkp - Lk), (0, 0)))
    kernel = functools.partial(_flash_kernel, scale=1.0 / math.sqrt(dh),
                               kv_len=Lk, tk=tk, need_mask=(Lkp != Lk))
    out = pl.pallas_call(
        kernel,
        grid=(n_heads, Lqp // tq, Lkp // tk),
        in_specs=[pl.BlockSpec((tq, 128), lambda h, i, j: (i, q_off + h)),
                  pl.BlockSpec((tk, 128), lambda h, i, j: (j, k_off + h)),
                  pl.BlockSpec((tk, 128), lambda h, i, j: (j, v_off + h))],
        out_specs=pl.BlockSpec((tq, 128), lambda h, i, j: (i, h)),
        out_shape=jax.ShapeDtypeStruct((Lqp, n_heads * 128), q.dtype),
        scratch_shapes=[pltpu.VMEM((tq, 1), jnp.float32),
                        pltpu.VMEM((tq, 1), jnp.float32),
                        pltpu.VMEM((tq, 128), jnp.float32)],
        compiler_params=pltpu.CompilerParams(
            dimension_semantics=("parallel", "parallel", "arbitrary"),
            vmem_limit_bytes=_VMEM_LIMIT),
    )(qp, kp, vp)
    return out[:Lq]


# ---------------------------------------------------------------------------
# Module forward functions (activations are compact tokens (H*W, C), bf16, batch=1)
# ---------------------------------------------------------------------------

def time_embedding_fwd(p, t):
    h = mm(t, p["l1"]["w"], p["l1"]["b"], act="silu")   # SiLU fused into the matmul epilogue
    return mm(h, p["l2"]["w"], p["l2"]["b"])


def self_attention_fwd(p, n_heads, dh, x, res):
    qkv = mm(x, p["w_qkv"])                             # (L, 3*H*128), no input-proj bias
    o = _attention(qkv, qkv, qkv, n_heads=n_heads, dh=dh,
                   q_off=0, k_off=n_heads, v_off=2 * n_heads)
    return mm(o, p["w_out"], p["b_out"], res=res)


def cross_attention_fwd(p, n_heads, dh, x, ctx, res):
    q = mm(x, p["w_q"])                                 # (Lq, H*128)
    kv = mm(ctx, p["w_kv"])                             # (Lk, 2*H*128)
    o = _attention(q, kv, kv, n_heads=n_heads, dh=dh, q_off=0, k_off=0, v_off=n_heads)
    return mm(o, p["w_out"], p["b_out"], res=res)


def residual_block_fwd(p, x_tok, H, W, time_act):
    # time_act = silu(time_embedding), hoisted out of the block (identical for every block).
    h = groupnorm(x_tok, p["gn1"], eps=1e-5, silu=True)
    tvec = mm(time_act, p["lt"]["w"], p["lt"]["b"])                     # (1, Cout)
    h = _conv3x3_s1(h, p["conv1"]["w9"], p["conv1"]["b"] + tvec[0], H=H, W=W)
    m = groupnorm(h, p["gn2"], eps=1e-5, silu=True)
    out = _conv3x3_s1(m, p["conv2"]["w9"], p["conv2"]["b"], H=H, W=W)
    if "resc" in p:
        return mm(x_tok, p["resc"]["w"], p["resc"]["b"], res=out)       # skip fused in epilogue
    return out + x_tok


def attention_block_fwd(p, x_tok, H, W, context):
    nh, dh = p["n_heads"], p["d_head"]
    residue_long = x_tok
    h = groupnorm(x_tok, p["gn"], eps=1e-6, silu=False)
    t = mm(h, p["conv_in"]["w"], p["conv_in"]["b"])                     # 1x1 conv == linear
    res = t
    t = self_attention_fwd(p["attn1"], nh, dh, layernorm(t, p["ln1"]), res)
    res = t
    t = cross_attention_fwd(p["attn2"], nh, dh, layernorm(t, p["ln2"]), context, res)
    res = t
    u = layernorm(t, p["ln3"])
    hg = mm_geglu(u, p["geglu1"])                                       # (A@Wx+bx)*gelu(A@Wg+bg)
    t = mm(hg, p["geglu2"]["w"], p["geglu2"]["b"], res=res)
    return mm(t, p["conv_out"]["w"], p["conv_out"]["b"], res=residue_long)


def upsample_fwd(p, x, H, W):
    C = x.shape[1]
    xs = x.reshape(H, W, C)
    xs = jnp.repeat(jnp.repeat(xs, 2, axis=0), 2, axis=1)               # nearest, scale 2
    x2 = xs.reshape(4 * H * W, C)
    out = _conv3x3_s1(x2, p["conv"]["w9"], p["conv"]["b"], H=2 * H, W=2 * W)
    return out, 2 * H, 2 * W


def switch_seq(layers, x, H, W, context, time_act):
    for layer in layers:
        kind = layer["type"]
        if kind == "res":
            x = residual_block_fwd(layer, x, H, W, time_act)
        elif kind == "attn":
            x = attention_block_fwd(layer, x, H, W, context)
        elif kind == "conv":
            x, H, W = conv_layer_fwd(layer, x, H, W)
        elif kind == "upsample":
            x, H, W = upsample_fwd(layer, x, H, W)
    return x, H, W


def unet_fwd(p, x, H, W, context, time_act):
    skips = []
    for layers in p["encoders"]:
        x, H, W = switch_seq(layers, x, H, W, context, time_act)
        skips.append(x)
    x, H, W = switch_seq(p["bottleneck"], x, H, W, context, time_act)
    for layers in p["decoders"]:
        x = jnp.concatenate([x, skips.pop()], axis=1)       # channel concat in token layout
        x, H, W = switch_seq(layers, x, H, W, context, time_act)
    return x, H, W


def diffusion_fwd(p, latent, context, time):
    assert latent.shape[0] == 1 and context.shape[0] == 1, "demo handles batch=1"
    _, Cin, H, W = latent.shape
    temb = time_embedding_fwd(p["time_embedding"], time)
    time_act = silu_pallas(temb)          # shared silu(time) hoisted out of the residual blocks
    x = latent[0].transpose(1, 2, 0).reshape(H * W, Cin).astype(jnp.bfloat16)
    ctx = context[0].astype(jnp.bfloat16)
    x, Ho, Wo = unet_fwd(p["unet"], x, H, W, ctx, time_act)
    h = groupnorm(x, p["final"]["gn"], eps=1e-5, silu=True)
    out = _conv3x3_s1(h, p["final"]["conv"]["w9"], p["final"]["conv"]["b"], H=Ho, W=Wo)
    out = out.reshape(Ho, Wo, -1).transpose(2, 0, 1)[None]
    return out.astype(jnp.float32)


# ---------------------------------------------------------------------------
# Deterministic parameter construction (synthetic, kernel-ready layout, bf16 weights)
# ---------------------------------------------------------------------------

class _Init:
    def __init__(self, seed=0):
        self.rng = np.random.default_rng(seed)

    def _normal(self, shape, scale, dtype=jnp.bfloat16):
        a = self.rng.standard_normal(shape, dtype=np.float32) * np.float32(scale)
        return jnp.asarray(a, dtype=dtype)

    def linear(self, fin, fout, bias=True):
        p = {"w": self._normal((fin, fout), 1.0 / math.sqrt(fin))}
        if bias:
            p["b"] = self._normal((fout,), 0.02, jnp.float32)
        return p

    def conv3(self, cin, cout, stride=1):
        fan = cin * 9
        return {"w9": self._normal((9, cin, cout), 1.0 / math.sqrt(fan)),
                "b": self._normal((cout,), 0.02, jnp.float32),
                "stride": stride, "cout": cout}

    def norm(self, c):
        return {"g": jnp.ones((c,), jnp.float32), "b": jnp.zeros((c,), jnp.float32)}

    def attn_in(self, fin, heads, dh):
        """(fin, heads*128) projection, head dim padded to 128 lanes with zero columns."""
        w = self.rng.standard_normal((fin, heads, dh), dtype=np.float32) / math.sqrt(fin)
        w = np.pad(w, ((0, 0), (0, 0), (0, 128 - dh)))
        return jnp.asarray(w.reshape(fin, heads * 128), jnp.bfloat16)

    def attn_out(self, heads, dh, fout):
        """(heads*128, fout) output projection; rows for pad lanes are zero."""
        w = self.rng.standard_normal((heads, dh, fout), dtype=np.float32) / math.sqrt(heads * dh)
        w = np.pad(w, ((0, 0), (0, 128 - dh), (0, 0)))
        return jnp.asarray(w.reshape(heads * 128, fout), jnp.bfloat16)


def build_params(seed=0, channel_scale=5):
    """channel_scale=1 gives the exact SD-1.x widths (320/640/1280); channel_scale=5 gives a
    structurally identical width-scaled UNet (64/128/256) used by the demo for runtime budget."""
    init = _Init(seed)
    c1, c2, c3 = 320 // channel_scale, 640 // channel_scale, 1280 // channel_scale
    d1, d2, d3 = c1 // 8, c2 // 8, c3 // 8
    n_time = 1280
    ctx_dim = 768

    def conv_layer(cin, cout, stride):
        return {"type": "conv", **init.conv3(cin, cout, stride)}

    def res_block(cin, cout):
        p = {"type": "res",
             "gn1": init.norm(cin),
             "conv1": init.conv3(cin, cout),
             "lt": init.linear(n_time, cout),
             "gn2": init.norm(cout),
             "conv2": init.conv3(cout, cout)}
        if cin != cout:
            p["resc"] = init.linear(cin, cout)          # 1x1 conv == linear on tokens
        return p

    def attn_block(n_head, d_head):
        c = n_head * d_head
        return {"type": "attn", "n_heads": n_head, "d_head": d_head,
                "gn": init.norm(c),
                "conv_in": init.linear(c, c),
                "ln1": init.norm(c),
                "attn1": {"w_qkv": jnp.concatenate(
                              [init.attn_in(c, n_head, d_head) for _ in range(3)], axis=1),
                          "w_out": init.attn_out(n_head, d_head, c),
                          "b_out": init._normal((c,), 0.02, jnp.float32)},
                "ln2": init.norm(c),
                "attn2": {"w_q": init.attn_in(c, n_head, d_head),
                          "w_kv": jnp.concatenate(
                              [init.attn_in(ctx_dim, n_head, d_head) for _ in range(2)], axis=1),
                          "w_out": init.attn_out(n_head, d_head, c),
                          "b_out": init._normal((c,), 0.02, jnp.float32)},
                "ln3": init.norm(c),
                "geglu1": {"x": init.linear(c, 4 * c), "g": init.linear(c, 4 * c)},
                "geglu2": init.linear(4 * c, c),
                "conv_out": init.linear(c, c)}

    def upsample(c):
        return {"type": "upsample", "conv": init.conv3(c, c)}

    encoders = [
        [conv_layer(4, c1, 1)],
        [res_block(c1, c1), attn_block(8, d1)],
        [res_block(c1, c1), attn_block(8, d1)],
        [conv_layer(c1, c1, 2)],
        [res_block(c1, c2), attn_block(8, d2)],
        [res_block(c2, c2), attn_block(8, d2)],
        [conv_layer(c2, c2, 2)],
        [res_block(c2, c3), attn_block(8, d3)],
        [res_block(c3, c3), attn_block(8, d3)],
        [conv_layer(c3, c3, 2)],
        [res_block(c3, c3)],
        [res_block(c3, c3)],
    ]
    bottleneck = [res_block(c3, c3), attn_block(8, d3), res_block(c3, c3)]
    decoders = [
        [res_block(2 * c3, c3)],
        [res_block(2 * c3, c3)],
        [res_block(2 * c3, c3), upsample(c3)],
        [res_block(2 * c3, c3), attn_block(8, d3)],
        [res_block(2 * c3, c3), attn_block(8, d3)],
        [res_block(c3 + c2, c3), attn_block(8, d3), upsample(c3)],
        [res_block(c3 + c2, c2), attn_block(8, d2)],
        [res_block(2 * c2, c2), attn_block(8, d2)],
        [res_block(c2 + c1, c2), attn_block(8, d2), upsample(c2)],
        [res_block(c2 + c1, c1), attn_block(8, d1)],
        [res_block(2 * c1, c1), attn_block(8, d1)],
        [res_block(2 * c1, c1), attn_block(8, d1)],
    ]

    return {
        "time_embedding": {"l1": init.linear(320, n_time), "l2": init.linear(n_time, n_time)},
        "unet": {"encoders": encoders, "bottleneck": bottleneck, "decoders": decoders},
        "final": {"gn": init.norm(c1), "conv": init.conv3(c1, 4)},
    }


# ---------------------------------------------------------------------------
# Main
# ---------------------------------------------------------------------------

if __name__ == "__main__":
    key = jax.random.PRNGKey(0)
    k1, k2, k3 = jax.random.split(key, 3)
    # Small shapes consistent with the module: latent (1,4,H,W), context (1,Lc,768), time (1,320).
    latent = jax.random.normal(k1, (1, 4, 8, 8), jnp.float32)
    context = jax.random.normal(k2, (1, 16, 768), jnp.float32)
    time = jax.random.normal(k3, (1, 320), jnp.float32)

    params = build_params(seed=0, channel_scale=5)

    out = diffusion_fwd(params, latent, context, time)
    out = jax.block_until_ready(out)

    assert out.shape == (1, 4, 8, 8), out.shape
    assert out.dtype == jnp.float32
    assert bool(jnp.all(jnp.isfinite(out)))
    print("KERNEL_OK")
</pallas_src>

<mosaic_0001>
module attributes {stable_mosaic.version = 11 : i64} {
  func.func @_mm_kernel(%arg0: i32, %arg1: i32, %arg2: i32, %arg3: memref<128x128xbf16, #tpu.memory_space<vmem>>, %arg4: memref<128x256xbf16, #tpu.memory_space<vmem>>, %arg5: memref<1x256xf32, #tpu.memory_space<vmem>>, %arg6: memref<128x256xbf16, #tpu.memory_space<vmem>>, %arg7: memref<128x256xf32, #tpu.memory_space<vmem>>) attributes {dimension_semantics = [#tpu.dimension_semantics<parallel>, #tpu.dimension_semantics<parallel>, #tpu.dimension_semantics<arbitrary>], iteration_bounds = array<i64: 1, 5, 3>, scalar_prefetch = 0 : i64, scratch_operands = 1 : i64, tpu.core_type = #tpu.core_type<tc>, window_params = [{transform_indices = @transform_0, window_bounds = array<i64: 128, 128>}, {transform_indices = @transform_1, window_bounds = array<i64: 128, 256>}, {transform_indices = @transform_2, window_bounds = array<i64: 1, 256>}, {transform_indices = @transform_3, window_bounds = array<i64: 128, 256>}]} {
    %c0_i32 = arith.constant 0 : i32
    %0 = arith.cmpi eq, %arg2, %c0_i32 : i32
    %1 = arith.extui %0 : i1 to i32
    %c0_i32_0 = arith.constant 0 : i32
    %2 = arith.cmpi ne, %1, %c0_i32_0 : i32
    scf.if %2 {
      %cst_9 = arith.constant 0.000000e+00 : f32
      %12 = vector.broadcast %cst_9 : f32 to vector<128x256xf32>
      %c0_10 = arith.constant 0 : index
      %c0_11 = arith.constant 0 : index
      %13 = vector.load %arg7[%c0_10, %c0_11] : memref<128x256xf32, #tpu.memory_space<vmem>>, vector<128x256xf32>
      tpu.vector_store %arg7[%c0_10, %c0_11], %12 {strides = array<i32>} : memref<128x256xf32, #tpu.memory_space<vmem>>, vector<128x256xf32>,
    } else {
    }
    %c0 = arith.constant 0 : index
    %c0_1 = arith.constant 0 : index
    %3 = vector.load %arg7[%c0, %c0_1] : memref<128x256xf32, #tpu.memory_space<vmem>>, vector<128x256xf32>
    %c0_2 = arith.constant 0 : index
    %c0_3 = arith.constant 0 : index
    %4 = vector.load %arg3[%c0_2, %c0_3] : memref<128x128xbf16, #tpu.memory_space<vmem>>, vector<128x128xbf16>
    %c0_4 = arith.constant 0 : index
    %c0_5 = arith.constant 0 : index
    %5 = vector.load %arg4[%c0_4, %c0_5] : memref<128x256xbf16, #tpu.memory_space<vmem>>, vector<128x256xbf16>
    %cst = arith.constant dense<0.000000e+00> : vector<128x256xf32>
    %6 = tpu.matmul %4, %5, %cst {dimension_numbers = #tpu.dot_dimension_numbers<[1], [0], [0], [1], [0, 0, 1, 1], [], []>} : vector<128x128xbf16>, vector<128x256xbf16>, vector<128x256xf32> -> vector<128x256xf32>
    %7 = arith.addf %3, %6 : vector<128x256xf32>
    %c0_6 = arith.constant 0 : index
    %c0_7 = arith.constant 0 : index
    %8 = vector.load %arg7[%c0_6, %c0_7] : memref<128x256xf32, #tpu.memory_space<vmem>>, vector<128x256xf32>
    tpu.vector_store %arg7[%c0_6, %c0_7], %7 {strides = array<i32>} : memref<128x256xf32, #tpu.memory_space<vmem>>, vector<128x256xf32>,
    %c2_i32 = arith.constant 2 : i32
    %9 = arith.cmpi eq, %arg2, %c2_i32 : i32
    %10 = arith.extui %9 : i1 to i32
    %c0_i32_8 = arith.constant 0 : i32
    %11 = arith.cmpi ne, %10, %c0_i32_8 : i32
    scf.if %11 {
      %c0_9 = arith.constant 0 : index
      %c0_10 = arith.constant 0 : index
      %12 = vector.load %arg7[%c0_9, %c0_10] : memref<128x256xf32, #tpu.memory_space<vmem>>, vector<128x256xf32>
      %c0_11 = arith.constant 0 : index
      %c0_12 = arith.constant 0 : index
      %13 = vector.load %arg5[%c0_11, %c0_12] : memref<1x256xf32, #tpu.memory_space<vmem>>, vector<1x256xf32>
      %14 = vector.broadcast %13 : vector<1x256xf32> to vector<128x256xf32>
      %15 = arith.addf %12, %14 : vector<128x256xf32>
      %16 = arith.negf %15 : vector<128x256xf32>
      %17 = math.exp %16 : vector<128x256xf32>
      %cst_13 = arith.constant 1.000000e+00 : f32
      %18 = vector.broadcast %cst_13 : f32 to vector<128x256xf32>
      %19 = arith.addf %18, %17 : vector<128x256xf32>
      %20 = arith.divf %18, %19 : vector<128x256xf32>
      %21 = arith.mulf %15, %20 : vector<128x256xf32>
      %22 = arith.truncf %21 : vector<128x256xf32> to vector<128x256xbf16>
      %c0_14 = arith.constant 0 : index
      %c0_15 = arith.constant 0 : index
      %23 = vector.load %arg6[%c0_14, %c0_15] : memref<128x256xbf16, #tpu.memory_space<vmem>>, vector<128x256xbf16>
      tpu.vector_store %arg6[%c0_14, %c0_15], %22 {strides = array<i32>} : memref<128x256xbf16, #tpu.memory_space<vmem>>, vector<128x256xbf16>,
    } else {
    }
    return
  }
  func.func @transform_0(%arg0: i32, %arg1: i32, %arg2: i32) -> (i32, i32) {
    %c0_i32 = arith.constant 0 : i32
    return %arg0, %arg2 : i32, i32
  }
  func.func @transform_1(%arg0: i32, %arg1: i32, %arg2: i32) -> (i32, i32) {
    %c0_i32 = arith.constant 0 : i32
    return %arg2, %arg1 : i32, i32
  }
  func.func @transform_2(%arg0: i32, %arg1: i32, %arg2: i32) -> (i32, i32) {
    %c0_i32 = arith.constant 0 : i32
    %c0_i32_0 = arith.constant 0 : i32
    return %c0_i32, %arg1 : i32, i32
  }
  func.func @transform_3(%arg0: i32, %arg1: i32, %arg2: i32) -> (i32, i32) {
    %c0_i32 = arith.constant 0 : i32
    return %arg0, %arg1 : i32, i32
  }
}

</mosaic_0001>

<bundles_post_ra>
// kernel: _mm.1
= control target key start
LH: loop header
LB: loop body
LE: loop exit
PB: predicated region body
PF: predicated region fallthrough
CT: control target
= control target key end

     0   :  { %s2400_s0 = inlined_call_operand.vmem [shape: bf16[128,384], index: 0, kind: input, shape index: {}]   ;;  %s2401_s1 = inlined_call_operand.vmem [shape: bf16[384,1280], index: 1, kind: input, shape index: {}]   ;;  %s2402_s2 = inlined_call_operand.vmem [shape: f32[1,1280], index: 2, kind: input, shape index: {}]   ;;  %s2403_s3 = inlined_call_operand.vmem [shape: bf16[128,1280], index: 3, kind: output, shape index: {}]  }
   0x1   :  { %2405 = sst [smem:[#allocation7_spill]] %s2400_s0 }
   0x2   :  { %2406 = sst [smem:[#allocation8_spill]] %s2401_s1 }
   0x3   :  { %s1958_s12 = smov 0   ;;  %s1960_s13 = smov 0  }
   0x4   :  { %s1962_s14 = smov 0   ;;  %s1964_s15 = smov 0  }
   0x5   :  { %s1966_s16 = smov 0   ;;  %s1968_s17 = smov 0  }
   0x6   :  { %s1970_s18 = smov 0   ;;  %s1972_s19 = smov 0  }
   0x7   :  { %s1974_s20 = smov 0   ;;  %s1976_s21 = smov 0  }
   0x8   :  { %s1978_s22 = smov 0  }
   0x9 LB: > { %s1469_s23 = sadd.s32 4294967295, %s1934_s22   ;;  %s25_s24 = sadd.s32 1, %s1926_s20  ;;  %s1934_s22 = sphi %s1978_s22, %s13_s22   ;;  %s1930_s21 = sphi %s1976_s21, %s2423_s21   ;;  %s1926_s20 = sphi %s1974_s20, %s2422_s20   ;;  %s1922_s19 = sphi %s1972_s19, %s2421_s19   ;;  %s1918_s18 = sphi %s1970_s18, %s2420_s18   ;;  %s1914_s17 = sphi %s1968_s17, %s2419_s17   ;;  %s1910_s16 = sphi %s1966_s16, %s2418_s16   ;;  %s1906_s15 = sphi %s1964_s15, %s2417_s15   ;;  %s1902_s14 = sphi %s1962_s14, %s2416_s14   ;;  %s1898_s13 = sphi %s1960_s13, %s2415_s13   ;;  %s1894_s12 = sphi %s1958_s12, %s2414_s12  }
   0xa   : > { %p26_p0 = scmp.ge.s32.totalorder %s25_s24, 3  ;;  %s28_s25 = sadd.s32 1, %s1930_s21 }
   0xb   : > { %s41_s26 = sadd.s32 1, %s1914_s17  ;;  %p48_p1 = scmp.ne.s32.totalorder %s1914_s17, %s1910_s16 }
   0xc   : > { %s2425_s24 = smov (%p26_p0, %s25_s24), 0  ;;  %s2427_s25 = smov (!%p26_p0, %s28_s25), %s1930_s21 }
   0xd   : > { %s37_s27 = ssub.s32 %s1926_s20, %s2425_s24  ;;  %p49_p2 = scmp.eq.s32.totalorder %s1934_s22, 0 }
   0xe   : > { %p30_p3 = scmp.ge.s32.totalorder %s2427_s25, 5  ;;  %p39_p4 = scmp.eq.s32.totalorder %s37_s27, 0 }
   0xf   : > { %p2025_p5 = por %p49_p2, %p48_p1  ;;  %s69_s29 = sadd.s32 1, %s1906_s15 }
  0x10   : > { %s2429_s25 = smov (%p30_p3, %s2427_s25), 0  ;;  %p76_p6 = scmp.ne.s32.totalorder %s1906_s15, %s1902_s14 }
  0x11   : > { %2408 = sst [smem:[#allocation6_spill]] %s2429_s25  ;;  %s65_s4 = ssub.s32 %s1930_s21, %s2429_s25 }
  0x12   : > { %s2033_s30 = scalar_select %p39_p4, %s1914_s17, %s41_s26  }
  0x13   : > { %s66_s5 = sor.u32 %s65_s4, %s37_s27  ;;  %p121_p7 = scmp.eq.s32.totalorder %s65_s4, 0 }
  0x14   : > { %p67_p8 = scmp.eq.s32.totalorder %s66_s5, 0  ;;  %p2039_p9 = por %p76_p6, %p49_p2 }
  0x15   : > { %s123_s7 = sadd.s32 1, %s1898_s13  ;;  %p133_p10 = scmp.ne.s32.totalorder %s1898_s13, %s1894_s12 }
  0x16   : > { %s2047_s8 = scalar_select %p67_p8, %s1906_s15, %s69_s29  }
  0x17   : > { %s2050_s9 = scalar_select %p121_p7, %s1898_s13, %s123_s7  }
  0x18   : > { %p134_p11 = scmp.eq.s32.totalorder %s1469_s23, 14  ;;  %p1472_p13 = scmp.ge.s32.totalorder %s1934_s22, 15 }
  0x1a   : > { %p2052_p12 = por %p134_p11, %p133_p10  ;;  %156 = sbr.rel (%p1472_p13) target bundleno = 71 (0x47), region = 16 }
  0x21   : > { %159 = sbr.rel (!%p2025_p5) target bundleno = 53 (0x35), region = 20  ;;  %s161_s11 = sand.u32 (%p2025_p5), 1, %s1914_s17  }
  0x22   : > { %s1474_s26 = sshll.u32 (%p2025_p5), %s1926_s20, 2  ;;  %s1473_s27 = sshll.u32 (%p2025_p5), %s161_s11, 6 }
  0x23   : > { %s2411_s0 = sld [smem:[#allocation7_spill]] (%p2025_p5)  ;;  %s163_s23 = scalar_lea.vmem (%p2025_p5), [#allocation3], %s1473_s27 }
  0x29   : > { %s2064_s5 = scalar_lea.vmem %s2411_s0, %s1474_s26 }
  0x2a   : > { %v184_v0 = vld [vmem:[%s2064_s5] sm:$0xf]  ;;  %v186_v1 = vld [vmem:[%s2064_s5 + $0xc] sm:$0xf]  ;;  %v188_v2 = vld [vmem:[%s2064_s5 + $0x18] sm:$0xf] }
  0x2b   : > { %185 = vst [vmem:[%s163_s23] sm:$0xf] %v184_v0  ;;  %187 = vst [vmem:[%s163_s23 + $0x4] sm:$0xf] %v186_v1  ;;  %v190_v3 = vld [vmem:[%s2064_s5 + $0x24] sm:$0xf] }
  0x2c   : > { %v192_v4 = vld [vmem:[%s2064_s5 + $0x30] sm:$0xf]  ;;  %189 = vst [vmem:[%s163_s23 + $0x8] sm:$0xf] %v188_v2  ;;  %191 = vst [vmem:[%s163_s23 + $0xc] sm:$0xf] %v190_v3 }
  0x2d   : > { %193 = vst [vmem:[%s163_s23 + $0x10] sm:$0xf] %v192_v4  ;;  %v194_v5 = vld [vmem:[%s2064_s5 + $0x3c] sm:$0xf]  ;;  %v196_v6 = vld [vmem:[%s2064_s5 + $0x48] sm:$0xf] }
  0x2e   : > { %v198_v7 = vld [vmem:[%s2064_s5 + $0x54] sm:$0xf]  ;;  %195 = vst [vmem:[%s163_s23 + $0x14] sm:$0xf] %v194_v5  ;;  %197 = vst [vmem:[%s163_s23 + $0x18] sm:$0xf] %v196_v6 }
  0x2f   : > { %199 = vst [vmem:[%s163_s23 + $0x1c] sm:$0xf] %v198_v7  ;;  %v200_v8 = vld [vmem:[%s2064_s5 + $0x60] sm:$0xf]  ;;  %v202_v9 = vld [vmem:[%s2064_s5 + $0x6c] sm:$0xf] }
  0x30   : > { %v204_v10 = vld [vmem:[%s2064_s5 + $0x78] sm:$0xf]  ;;  %201 = vst [vmem:[%s163_s23 + $0x20] sm:$0xf] %v200_v8  ;;  %203 = vst [vmem:[%s163_s23 + $0x24] sm:$0xf] %v202_v9 }
  0x31   : > { %205 = vst [vmem:[%s163_s23 + $0x28] sm:$0xf] %v204_v10  ;;  %v206_v11 = vld [vmem:[%s2064_s5 + $0x84] sm:$0xf]  ;;  %v208_v12 = vld [vmem:[%s2064_s5 + $0x90] sm:$0xf] }
  0x32   : > { %v210_v13 = vld [vmem:[%s2064_s5 + $0x9c] sm:$0xf]  ;;  %207 = vst [vmem:[%s163_s23 + $0x2c] sm:$0xf] %v206_v11  ;;  %209 = vst [vmem:[%s163_s23 + $0x30] sm:$0xf] %v208_v12 }
  0x33   : > { %211 = vst [vmem:[%s163_s23 + $0x34] sm:$0xf] %v210_v13  ;;  %v212_v14 = vld [vmem:[%s2064_s5 + $0xa8] sm:$0xf]  ;;  %v214_v15 = vld [vmem:[%s2064_s5 + $0xb4] sm:$0xf] }
  0x34   : > { %213 = vst [vmem:[%s163_s23 + $0x38] sm:$0xf] %v212_v14  ;;  %215 = vst [vmem:[%s163_s23 + $0x3c] sm:$0xf] %v214_v15 }
  0x35 PF: > { %270 = sbr.rel (!%p2039_p9) target bundleno = 71 (0x47), region = 61  ;;  %s272_s28 = sand.u32 (%p2039_p9), 1, %s1906_s15  }
  0x36   : > { %s1477_s7 = sshll.u32 (%p2039_p9), %s1930_s21, 1  ;;  %s1475_s11 = sshll.u32 (%p2039_p9), %s272_s28, 7 }
  0x37   : > { %s1597_s26 = smul.u32 (%p2039_p9), 160, %s1926_s20  ;;  %s2412_s1 = sld [smem:[#allocation8_spill]] (%p2039_p9) }
  0x38   : > { %s274_s6 = scalar_lea.vmem (%p2039_p9), [#allocation4], %s1475_s11 }
  0x39   : > { %s278_s27 = sadd.s32 (%p2039_p9), %s1597_s26, %s1477_s7 }
  0x3a   : > { %s1479_s29 = sshll.u32 (%p2039_p9), %s278_s27, 2 }
  0x3d   : > { %s2090_s25 = scalar_lea.vmem %s2412_s1, %s1479_s29 }
  0x3e   : > { %v338_v16 = vld [vmem:[%s2090_s25] sm:$0xff]  ;;  %v340_v17 = vld [vmem:[%s2090_s25 + $0x28] sm:$0xff]  ;;  %v342_v18 = vld [vmem:[%s2090_s25 + $0x50] sm:$0xff] }
  0x3f   : > { %339 = vst [vmem:[%s274_s6] sm:$0xff] %v338_v16  ;;  %341 = vst [vmem:[%s274_s6 + $0x8] sm:$0xff] %v340_v17  ;;  %v344_v19 = vld [vmem:[%s2090_s25 + $0x78] sm:$0xff]  ;;  %v346_v20 = vld [vmem:[%s2090_s25 + $0xa0] sm:$0xff] }
  0x40   : > { %343 = vst [vmem:[%s274_s6 + $0x10] sm:$0xff] %v342_v18  ;;  %v348_v21 = vld [vmem:[%s2090_s25 + $0xc8] sm:$0xff]  ;;  %345 = vst [vmem:[%s274_s6 + $0x18] sm:$0xff] %v344_v19  ;;  %v350_v22 = vld [vmem:[%s2090_s25 + $0xf0] sm:$0xff] }
  0x41   : > { %347 = vst [vmem:[%s274_s6 + $0x20] sm:$0xff] %v346_v20  ;;  %349 = vst [vmem:[%s274_s6 + $0x28] sm:$0xff] %v348_v21  ;;  %v352_v23 = vld [vmem:[%s2090_s25 + $0x118] sm:$0xff]  ;;  %v354_v24 = vld [vmem:[%s2090_s25 + $0x140] sm:$0xff] }
  0x42   : > { %351 = vst [vmem:[%s274_s6 + $0x30] sm:$0xff] %v350_v22  ;;  %353 = vst [vmem:[%s274_s6 + $0x38] sm:$0xff] %v352_v23  ;;  %v356_v25 = vld [vmem:[%s2090_s25 + $0x168] sm:$0xff]  ;;  %v358_v26 = vld [vmem:[%s2090_s25 + $0x190] sm:$0xff] }
  0x43   : > { %355 = vst [vmem:[%s274_s6 + $0x40] sm:$0xff] %v354_v24  ;;  %v360_v27 = vld [vmem:[%s2090_s25 + $0x1b8] sm:$0xff]  ;;  %357 = vst [vmem:[%s274_s6 + $0x48] sm:$0xff] %v356_v25  ;;  %v362_v28 = vld [vmem:[%s2090_s25 + $0x1e0] sm:$0xff] }
  0x44   : > { %359 = vst [vmem:[%s274_s6 + $0x50] sm:$0xff] %v358_v26  ;;  %361 = vst [vmem:[%s274_s6 + $0x58] sm:$0xff] %v360_v27  ;;  %v364_v29 = vld [vmem:[%s2090_s25 + $0x208] sm:$0xff]  ;;  %v366_v30 = vld [vmem:[%s2090_s25 + $0x230] sm:$0xff] }
  0x45   : > { %363 = vst [vmem:[%s274_s6 + $0x60] sm:$0xff] %v362_v28  ;;  %365 = vst [vmem:[%s274_s6 + $0x68] sm:$0xff] %v364_v29  ;;  %v368_v31 = vld [vmem:[%s2090_s25 + $0x258] sm:$0xff] }
  0x46   : > { %367 = vst [vmem:[%s274_s6 + $0x70] sm:$0xff] %v366_v30  ;;  %369 = vst [vmem:[%s274_s6 + $0x78] sm:$0xff] %v368_v31 }
  0x47 PF: > { %p1480_p0 = scmp.ge.s32.totalorder %s1934_s22, 1  ;;  %p382_p1 = scmp.lt.s32.totalorder %s1934_s22, 16 }
  0x49   : > { %p383_p2 = pnand %p1480_p0, %p382_p1 }
  0x4a   : > { %s389_s0 = sand.u32 (!%p383_p2), 1, %s1910_s16   ;;  %s396_s5 = sand.u32 (!%p383_p2), 1, %s1902_s14  }
  0x4b   : > { %386 = sbr.rel (%p383_p2) target bundleno = 468 (0x1d4), region = 103  ;;  %s1481_s23 = sshll.u32 (!%p383_p2), %s389_s0, 6 }
  0x4c   : > { %s1482_s28 = sshll.u32 (!%p383_p2), %s396_s5, 7  ;;  %s423_s7 = sand.u32 (!%p383_p2), 1, %s1894_s12  }
  0x4d   : > { %s1484_s11 = sshll.u32 (!%p383_p2), %s1922_s19, 1  ;;  %s1483_s25 = sshll.u32 (!%p383_p2), %s423_s7, 7 }
  0x4e   : > { %p430_p3 = scmp.lt.s32.totalorder (!%p383_p2), %s1484_s11, 9  ;;  %s2120_s4 = scalar_lea.vmem (!%p383_p2), [#allocation3], %s1481_s23 }
  0x4f   : > { %s2122_s6 = scalar_lea.vmem (!%p383_p2), [#allocation4], %s1482_s28  ;;  %s2124_s1 = scalar_lea.vmem (!%p383_p2), [#allocation5], %s1483_s25 }
  0x50   : > { %p1485_p4 = scmp.ne.s32.totalorder (!%p383_p2), %s1918_s18, 0 }
  0x52   : > { %s2431_s11 = smov (!%p430_p3, %s1484_s11), 9  ;;  %440 = sbr.rel (%p1485_p4) target bundleno = 100 (0x64), region = 115 }
  0x53   : > { %s432_s29 = scalar_lea.vmem %s2402_s2, %s2431_s11  ;;  %v1936_v32 = vmov (!%p1485_p4), 0.0  }
  0x54   : > { %441 = vst [vmem:[#allocation2] sm:$0xff] (!%p1485_p4), %v1936_v32  ;;  %442 = vst [vmem:[#allocation2 + $0x8] sm:$0xff] (!%p1485_p4), %v1936_v32 }
  0x55   : > { %443 = vst [vmem:[#allocation2 + $0x10] sm:$0xff] (!%p1485_p4), %v1936_v32  ;;  %444 = vst [vmem:[#allocation2 + $0x18] sm:$0xff] (!%p1485_p4), %v1936_v32 }
  0x56   : > { %445 = vst [vmem:[#allocation2 + $0x20] sm:$0xff] (!%p1485_p4), %v1936_v32  ;;  %446 = vst [vmem:[#allocation2 + $0x28] sm:$0xff] (!%p1485_p4), %v1936_v32 }
  0x57   : > { %447 = vst [vmem:[#allocation2 + $0x30] sm:$0xff] (!%p1485_p4), %v1936_v32  ;;  %448 = vst [vmem:[#allocation2 + $0x38] sm:$0xff] (!%p1485_p4), %v1936_v32 }
  0x58   : > { %449 = vst [vmem:[#allocation2 + $0x40] sm:$0xff] (!%p1485_p4), %v1936_v32  ;;  %450 = vst [vmem:[#allocation2 + $0x48] sm:$0xff] (!%p1485_p4), %v1936_v32 }
  0x59   : > { %451 = vst [vmem:[#allocation2 + $0x50] sm:$0xff] %v1936_v32  ;;  %452 = vst [vmem:[#allocation2 + $0x58] sm:$0xff] %v1936_v32 }
  0x5a   : > { %453 = vst [vmem:[#allocation2 + $0x60] sm:$0xff] %v1936_v32  ;;  %454 = vst [vmem:[#allocation2 + $0x68] sm:$0xff] %v1936_v32 }
  0x5b   : > { %455 = vst [vmem:[#allocation2 + $0x70] sm:$0xff] %v1936_v32  ;;  %456 = vst [vmem:[#allocation2 + $0x78] sm:$0xff] %v1936_v32 }
  0x5c   : > { %457 = vst [vmem:[#allocation2 + $0x80] sm:$0xff] %v1936_v32  ;;  %458 = vst [vmem:[#allocation2 + $0x88] sm:$0xff] %v1936_v32 }
  0x5d   : > { %459 = vst [vmem:[#allocation2 + $0x90] sm:$0xff] %v1936_v32  ;;  %460 = vst [vmem:[#allocation2 + $0x98] sm:$0xff] %v1936_v32 }
  0x5e   : > { %461 = vst [vmem:[#allocation2 + $0xa0] sm:$0xff] %v1936_v32  ;;  %462 = vst [vmem:[#allocation2 + $0xa8] sm:$0xff] %v1936_v32 }
  0x5f   : > { %463 = vst [vmem:[#allocation2 + $0xb0] sm:$0xff] %v1936_v32  ;;  %464 = vst [vmem:[#allocation2 + $0xb8] sm:$0xff] %v1936_v32 }
  0x60   : > { %465 = vst [vmem:[#allocation2 + $0xc0] sm:$0xff] %v1936_v32  ;;  %466 = vst [vmem:[#allocation2 + $0xc8] sm:$0xff] %v1936_v32 }
  0x61   : > { %467 = vst [vmem:[#allocation2 + $0xd0] sm:$0xff] %v1936_v32  ;;  %468 = vst [vmem:[#allocation2 + $0xd8] sm:$0xff] %v1936_v32 }
  0x62   : > { %469 = vst [vmem:[#allocation2 + $0xe0] sm:$0xff] %v1936_v32  ;;  %470 = vst [vmem:[#allocation2 + $0xe8] sm:$0xff] %v1936_v32 }
  0x63   : > { %471 = vst [vmem:[#allocation2 + $0xf0] sm:$0xff] %v1936_v32  ;;  %472 = vst [vmem:[#allocation2 + $0xf8] sm:$0xff] %v1936_v32 }
  0x64 PF: > { %v1688_v33 = vld [vmem:[%s2122_s6 + $0x4] ss:$8 sps:$4 sm:$0xff]   ;;  %v1690_v34 = vld [vmem:[%s2122_s6] ss:$8 sps:$4 sm:$0xff]   ;;  %v1937_v35 = vmov 0   ;;  %v1716_v54 = vld [vmem:[%s2120_s4 + $0x10] sm:$0xff]  }
  0x65   : > { %697 = vmatprep.mubr.bf16.mxu0 %v1937_v35  ;;  %737 = vmatprep.mubr.bf16.mxu1 %v1937_v35  ;;  %v1691_v36 = vld [vmem:[%s2122_s6 + $0x14] ss:$8 sps:$4 sm:$0xff]   ;;  %v1693_v37 = vld [vmem:[%s2122_s6 + $0x10] ss:$8 sps:$4 sm:$0xff]   ;;  %v1694_v38 = vld [vmem:[%s2122_s6 + $0x24] ss:$8 sps:$4 sm:$0xff]  }
  0x66   : > { %665 = vmatprep.subr.bf16.mxu0 %v1688_v33  ;;  %1581 = vmatprep.subr.bf16.mxu1 %v1688_v33  ;;  %v1696_v39 = vld [vmem:[%s2122_s6 + $0x20] ss:$8 sps:$4 sm:$0xff]   ;;  %v1697_v40 = vld [vmem:[%s2122_s6 + $0x34] ss:$8 sps:$4 sm:$0xff]   ;;  %v1699_v41 = vld [vmem:[%s2122_s6 + $0x30] ss:$8 sps:$4 sm:$0xff]  }
  0x67   : > { %666 = vmatpush1.bf16.msra.mxu0 %v1690_v34  ;;  %1589 = vmatpush1.bf16.msra.mxu1 %v1690_v34  ;;  %v1700_v42 = vld [vmem:[%s2122_s6 + $0x44] ss:$8 sps:$4 sm:$0xff]   ;;  %v1702_v43 = vld [vmem:[%s2122_s6 + $0x40] ss:$8 sps:$4 sm:$0xff]   ;;  %v1703_v44 = vld [vmem:[%s2122_s6 + $0x54] ss:$8 sps:$4 sm:$0xff]  }
  0x68   : > { %667 = vmatprep.subr.bf16.mxu0 %v1691_v36  ;;  %1582 = vmatprep.subr.bf16.mxu1 %v1691_v36  ;;  %v1705_v45 = vld [vmem:[%s2122_s6 + $0x50] ss:$8 sps:$4 sm:$0xff]   ;;  %v1706_v46 = vld [vmem:[%s2122_s6 + $0x64] ss:$8 sps:$4 sm:$0xff]   ;;  %v1708_v47 = vld [vmem:[%s2122_s6 + $0x60] ss:$8 sps:$4 sm:$0xff]  }
  0x69   : > { %v1709_v48 = vld [vmem:[%s2122_s6 + $0x74] ss:$8 sps:$4 sm:$0xff]   ;;  %v1711_v49 = vld [vmem:[%s2122_s6 + $0x70] ss:$8 sps:$4 sm:$0xff]   ;;  %v1712_v50 = vld [vmem:[%s2120_s4] sm:$0xff]   ;;  %p1510_p5 = scmp.ne.s32.totalorder %s1918_s18, 2 }
  0x6a   : > { %v1713_v51 = vld [vmem:[%s2120_s4 + $0x20] sm:$0xff]   ;;  %v1714_v52 = vld [vmem:[%s2120_s4 + $0x8] sm:$0xff]   ;;  %v1717_v55 = vld [vmem:[%s2120_s4 + $0x30] sm:$0xff]  }
  0x6b   : > { %668 = vmatpush1.bf16.msra.mxu0 %v1693_v37  ;;  %1590 = vmatpush1.bf16.msra.mxu1 %v1693_v37  ;;  %v1715_v53 = vld [vmem:[%s2120_s4 + $0x28] sm:$0xff]   ;;  %v1718_v56 = vld [vmem:[%s2120_s4 + $0x18] sm:$0xff]   ;;  %v473_v58 = vld [vmem:[#allocation2] sm:$0xff] }
  0x6c   : > { %669 = vmatprep.subr.bf16.mxu0 %v1694_v38  ;;  %1583 = vmatprep.subr.bf16.mxu1 %v1694_v38  ;;  %v1719_v57 = vld [vmem:[%s2120_s4 + $0x38] sm:$0xff]   ;;  %v489_v59 = vld [vmem:[#allocation2 + $0x80] sm:$0xff]  ;;  %v474_v60 = vld [vmem:[#allocation2 + $0x8] sm:$0xff] }
  0x6d   : > { %v490_v61 = vld [vmem:[#allocation2 + $0x88] sm:$0xff]  ;;  %v475_v0 = vld [vmem:[#allocation2 + $0x10] sm:$0xff]  ;;  %v476_v6 = vld [vmem:[#allocation2 + $0x18] sm:$0xff] }
  0x6e   : > { %v491_v1 = vld [vmem:[#allocation2 + $0x90] sm:$0xff]  ;;  %v492_v7 = vld [vmem:[#allocation2 + $0x98] sm:$0xff]  ;;  %v477_v18 = vld [vmem:[#allocation2 + $0x20] sm:$0xff] }
  0x6f   : > { %670 = vmatpush1.bf16.msra.mxu0 %v1696_v39  ;;  %1591 = vmatpush1.bf16.msra.mxu1 %v1696_v39  ;;  %v493_v19 = vld [vmem:[#allocation2 + $0xa0] sm:$0xff]  ;;  %v478_v20 = vld [vmem:[#allocation2 + $0x28] sm:$0xff]  ;;  %v479_v24 = vld [vmem:[#allocation2 + $0x30] sm:$0xff] }
  0x70   : > { %671 = vmatprep.subr.bf16.mxu0 %v1697_v40  ;;  %1584 = vmatprep.subr.bf16.mxu1 %v1697_v40  ;;  %v494_v21 = vld [vmem:[#allocation2 + $0xa8] sm:$0xff]  ;;  %v495_v25 = vld [vmem:[#allocation2 + $0xb0] sm:$0xff]  ;;  %v480_v30 = vld [vmem:[#allocation2 + $0x38] sm:$0xff] }
  0x71   : > { %v496_v31 = vld [vmem:[#allocation2 + $0xb8] sm:$0xff] }
  0x73   : > { %672 = vmatpush1.bf16.msra.mxu0 %v1699_v41  ;;  %1592 = vmatpush1.bf16.msra.mxu1 %v1699_v41 }
  0x74   : > { %673 = vmatprep.subr.bf16.mxu0 %v1700_v42  ;;  %1585 = vmatprep.subr.bf16.mxu1 %v1700_v42  ;;  %v481_v42 = vld [vmem:[#allocation2 + $0x40] sm:$0xff] }
  0x77   : > { %674 = vmatpush1.bf16.msra.mxu0 %v1702_v43  ;;  %1593 = vmatpush1.bf16.msra.mxu1 %v1702_v43  ;;  %v497_v43 = vld [vmem:[#allocation2 + $0xc0] sm:$0xff] }
  0x78   : > { %675 = vmatprep.subr.bf16.mxu0 %v1703_v44  ;;  %1586 = vmatprep.subr.bf16.mxu1 %v1703_v44  ;;  %v482_v44 = vld [vmem:[#allocation2 + $0x48] sm:$0xff] }
  0x7b   : > { %676 = vmatpush1.bf16.msra.mxu0 %v1705_v45  ;;  %1594 = vmatpush1.bf16.msra.mxu1 %v1705_v45  ;;  %v498_v45 = vld [vmem:[#allocation2 + $0xc8] sm:$0xff] }
  0x7c   : > { %677 = vmatprep.subr.bf16.mxu0 %v1706_v46  ;;  %1587 = vmatprep.subr.bf16.mxu1 %v1706_v46 }
  0x7f   : > { %678 = vmatpush1.bf16.msra.mxu0 %v1708_v47  ;;  %1595 = vmatpush1.bf16.msra.mxu1 %v1708_v47 }
  0x80   : > { %679 = vmatprep.subr.bf16.mxu0 %v1709_v48  ;;  %1588 = vmatprep.subr.bf16.mxu1 %v1709_v48  ;;  %v483_v48 = vld [vmem:[#allocation2 + $0x50] sm:$0xff] }
  0x83   : > { %680 = vmatpush1.bf16.msra.mxu0 %v1711_v49  ;;  %1596 = vmatpush1.bf16.msra.mxu1 %v1711_v49  ;;  %v499_v49 = vld [vmem:[#allocation2 + $0xd0] sm:$0xff] }
  0x86   : > { %698 = vmatmul.mubr.bf16.vlgmr.msra.gmra.mrb[0].mxu0 %v1712_v50  ;;  %738 = vmatmul.mubr.bf16.vlgmr.msra.gmra.mrb[0].mxu1 %v1713_v51 }
  0x87   : > { %707 = vmatprep.mubr.bf16.mxu0 %v1937_v35  ;;  %747 = vmatprep.mubr.bf16.mxu1 %v1937_v35 }
  0x8e   : > { %708 = vmatmul.mubr.bf16.gmra.mrb[4].mxu0 %v1714_v52  ;;  %748 = vmatmul.mubr.bf16.gmra.mrb[4].mxu1 %v1715_v53 }
  0x8f   : > { %717 = vmatprep.mubr.bf16.mxu0 %v1937_v35  ;;  %757 = vmatprep.mubr.bf16.mxu1 %v1937_v35 }
  0x96   : > { %718 = vmatmul.mubr.bf16.gmra.mrb[8].mxu0 %v1716_v54  ;;  %758 = vmatmul.mubr.bf16.gmra.mrb[8].mxu1 %v1717_v55  ;;  %v484_v54 = vld [vmem:[#allocation2 + $0x58] sm:$0xff] }
  0x97   : > { %727 = vmatprep.mubr.bf16.mxu0 %v1937_v35  ;;  %767 = vmatprep.mubr.bf16.mxu1 %v1937_v35  ;;  %v500_v55 = vld [vmem:[#allocation2 + $0xd8] sm:$0xff] }
  0x9e   : > { %728 = vmatmul.mubr.bf16.gmra.mrb[12].mxu0 %v1718_v56  ;;  %768 = vmatmul.mubr.bf16.gmra.mrb[12].mxu1 %v1719_v57 }
 0x159   : > { %v699_v62 = vpop.f32.mrb[0].mxu0  ;;  %v739_v63 = vpop.f32.mrb[0].mxu1 }
 0x15a   : > { %v778_v2 = vadd.f32 %v699_v62, %v473_v58  ;;  %v794_v3 = vadd.f32 %v739_v63, %v489_v59  ;;  %v701_v4 = vpop.f32.mrb[1].mxu0  ;;  %v741_v5 = vpop.f32.mrb[1].mxu1 }
 0x15b   : > { %v779_v8 = vadd.f32 %v701_v4, %v474_v60  ;;  %v795_v9 = vadd.f32 %v741_v5, %v490_v61  ;;  %v703_v10 = vpop.f32.mrb[2].mxu0  ;;  %v743_v11 = vpop.f32.mrb[2].mxu1  ;;  %v486_v4 = vld [vmem:[#allocation2 + $0x68] sm:$0xff] }
 0x15c   : > { %810 = vst [vmem:[#allocation2] sm:$0xff] %v778_v2  ;;  %826 = vst [vmem:[#allocation2 + $0x80] sm:$0xff] %v794_v3  ;;  %v780_v12 = vadd.f32 %v703_v10, %v475_v0  ;;  %v796_v13 = vadd.f32 %v743_v11, %v491_v1  ;;  %v705_v14 = vpop.f32.mrb[3].mxu0  ;;  %v745_v15 = vpop.f32.mrb[3].mxu1  ;;  %v485_v2 = vld [vmem:[#allocation2 + $0x60] sm:$0xff]  ;;  %v502_v5 = vld [vmem:[#allocation2 + $0xe8] sm:$0xff] }
 0x15d   : > { %811 = vst [vmem:[#allocation2 + $0x8] sm:$0xff] %v779_v8  ;;  %827 = vst [vmem:[#allocation2 + $0x88] sm:$0xff] %v795_v9  ;;  %v781_v16 = vadd.f32 %v705_v14, %v476_v6  ;;  %v797_v17 = vadd.f32 %v745_v15, %v492_v7  ;;  %v501_v3 = vld [vmem:[#allocation2 + $0xe0] sm:$0xff]  ;;  %v487_v8 = vld [vmem:[#allocation2 + $0x70] sm:$0xff] }
 0x15e   : > { %812 = vst [vmem:[#allocation2 + $0x10] sm:$0xff] %v780_v12  ;;  %828 = vst [vmem:[#allocation2 + $0x90] sm:$0xff] %v796_v13  ;;  %v503_v9 = vld [vmem:[#allocation2 + $0xf0] sm:$0xff]  ;;  %v488_v14 = vld [vmem:[#allocation2 + $0x78] sm:$0xff] }
 0x15f   : > { %813 = vst [vmem:[#allocation2 + $0x18] sm:$0xff] %v781_v16  ;;  %829 = vst [vmem:[#allocation2 + $0x98] sm:$0xff] %v797_v17  ;;  %v504_v15 = vld [vmem:[#allocation2 + $0xf8] sm:$0xff] }
 0x161   : > { %v709_v22 = vpop.f32.mrb[4].mxu0  ;;  %v749_v23 = vpop.f32.mrb[4].mxu1 }
 0x162   : > { %v782_v26 = vadd.f32 %v709_v22, %v477_v18  ;;  %v798_v27 = vadd.f32 %v749_v23, %v493_v19  ;;  %v711_v28 = vpop.f32.mrb[5].mxu0  ;;  %v751_v29 = vpop.f32.mrb[5].mxu1 }
 0x163   : > { %v783_v32 = vadd.f32 %v711_v28, %v478_v20  ;;  %v799_v33 = vadd.f32 %v751_v29, %v494_v21  ;;  %v713_v34 = vpop.f32.mrb[6].mxu0  ;;  %v753_v35 = vpop.f32.mrb[6].mxu1  ;;  %v878_v28 = vld [vmem:[%s432_s29] sm:$0x3] (!%p1510_p5) }
 0x164   : > { %814 = vst [vmem:[#allocation2 + $0x20] sm:$0xff] %v782_v26  ;;  %830 = vst [vmem:[#allocation2 + $0xa0] sm:$0xff] %v798_v27  ;;  %v784_v36 = vadd.f32 %v713_v34, %v479_v24  ;;  %v800_v37 = vadd.f32 %v753_v35, %v495_v25  ;;  %v715_v38 = vpop.f32.mrb[7].mxu0  ;;  %v755_v39 = vpop.f32.mrb[7].mxu1  ;;  %v880_v26 = vlaneseq (!%p1510_p5)  ;;  %v846_v29 = vld [vmem:[#allocation2] sm:$0xff] (!%p1510_p5) }
 0x165   : > { %815 = vst [vmem:[#allocation2 + $0x28] sm:$0xff] %v783_v32  ;;  %831 = vst [vmem:[#allocation2 + $0xa8] sm:$0xff] %v799_v33  ;;  %v785_v40 = vadd.f32 %v715_v38, %v480_v30  ;;  %v801_v41 = vadd.f32 %v755_v39, %v496_v31  ;;  %v847_v32 = vld [vmem:[#allocation2 + $0x8] sm:$0xff] (!%p1510_p5)  ;;  %v848_v33 = vld [vmem:[#allocation2 + $0x10] sm:$0xff] (!%p1510_p5) }
 0x166   : > { %816 = vst [vmem:[#allocation2 + $0x30] sm:$0xff] %v784_v36  ;;  %832 = vst [vmem:[#allocation2 + $0xb0] sm:$0xff] %v800_v37  ;;  %v881_v27 = vshrl.u32 (!%p1510_p5), %v880_v26, 7  ;;  %v849_v34 = vld [vmem:[#allocation2 + $0x18] sm:$0xff] (!%p1510_p5) }
 0x167   : > { %817 = vst [vmem:[#allocation2 + $0x38] sm:$0xff] %v785_v40  ;;  %833 = vst [vmem:[#allocation2 + $0xb8] sm:$0xff] %v801_v41 }
 0x168   : > { %v882_v30 = vsub.s32 (!%p1510_p5), 0, %v881_v27  ;;  %v886_v31 = vsub.s32 (!%p1510_p5), 1, %v881_v27  ;;  %v862_v27 = vld [vmem:[#allocation2 + $0x80] sm:$0xff] (!%p1510_p5) }
 0x169   : > { %v719_v46 = vpop.f32.mrb[8].mxu0  ;;  %v759_v47 = vpop.f32.mrb[8].mxu1 }
 0x16a   : > { %v786_v50 = vadd.f32 %v719_v46, %v481_v42  ;;  %v802_v51 = vadd.f32 %v759_v47, %v497_v43  ;;  %v721_v52 = vpop.f32.mrb[9].mxu0  ;;  %v761_v53 = vpop.f32.mrb[9].mxu1  ;;  %v2165_v35 = vrot.slane (!%p1510_p5), %v878_v28, %v882_v30  ;;  %v2167_v36 = vrot.slane (!%p1510_p5), %v878_v28, %v886_v31  ;;  %v863_v30 = vld [vmem:[#allocation2 + $0x88] sm:$0xff] (!%p1510_p5) }
 0x16b   : > { %v787_v56 = vadd.f32 %v721_v52, %v482_v44  ;;  %v803_v57 = vadd.f32 %v761_v53, %v498_v45  ;;  %v723_v58 = vpop.f32.mrb[10].mxu0  ;;  %v763_v59 = vpop.f32.mrb[10].mxu1  ;;  %v850_v37 = vld [vmem:[#allocation2 + $0x20] sm:$0xff] (!%p1510_p5) }
 0x16c   : > { %818 = vst [vmem:[#allocation2 + $0x40] sm:$0xff] %v786_v50  ;;  %834 = vst [vmem:[#allocation2 + $0xc0] sm:$0xff] %v802_v51  ;;  %v788_v60 = vadd.f32 %v723_v58, %v483_v48  ;;  %v804_v61 = vadd.f32 %v763_v59, %v499_v49  ;;  %v725_v62 = vpop.f32.mrb[11].mxu0  ;;  %v765_v63 = vpop.f32.mrb[11].mxu1  ;;  %v851_v38 = vld [vmem:[#allocation2 + $0x28] sm:$0xff] (!%p1510_p5)  ;;  %v2170_v40 = vadd.f32 (!%p1510_p5), %v2165_v35, %v846_v29 }
 0x16d   : > { %819 = vst [vmem:[#allocation2 + $0x48] sm:$0xff] %v787_v56  ;;  %835 = vst [vmem:[#allocation2 + $0xc8] sm:$0xff] %v803_v57  ;;  %v789_v0 = vadd.f32 %v725_v62, %v484_v54  ;;  %v805_v1 = vadd.f32 %v765_v63, %v500_v55  ;;  %v852_v39 = vld [vmem:[#allocation2 + $0x30] sm:$0xff] (!%p1510_p5)  ;;  %v2173_v41 = vadd.f32 (!%p1510_p5), %v2167_v36, %v847_v32 }
 0x16e   : > { %820 = vst [vmem:[#allocation2 + $0x50] sm:$0xff] %v788_v60  ;;  %836 = vst [vmem:[#allocation2 + $0xd0] sm:$0xff] %v804_v61  ;;  %v2176_v42 = vadd.f32 (!%p1510_p5), %v2165_v35, %v848_v33  ;;  %v2179_v43 = vadd.f32 (!%p1510_p5), %v2167_v36, %v849_v34  ;;  %v853_v44 = vld [vmem:[#allocation2 + $0x38] sm:$0xff] (!%p1510_p5)  ;;  %v2182_v45 = vadd.f32 (!%p1510_p5), %v2165_v35, %v850_v37  ;;  %v1511_v49 = vmul.f32 (!%p1510_p5), -1.442695, %v2170_v40  ;;  %v864_v37 = vld [vmem:[#allocation2 + $0x90] sm:$0xff] (!%p1510_p5) }
 0x16f   : > { %821 = vst [vmem:[#allocation2 + $0x58] sm:$0xff] %v789_v0  ;;  %837 = vst [vmem:[#allocation2 + $0xd8] sm:$0xff] %v805_v1  ;;  %v2185_v46 = vadd.f32 (!%p1510_p5), %v2167_v36, %v851_v38  ;;  %v1512_v50 = vmul.f32 (!%p1510_p5), -1.442695, %v2173_v41  ;;  %v2191_v52 = vadd.f32 (!%p1510_p5), %v2165_v35, %v852_v39  ;;  %v2195_v54 = vadd.f32 (!%p1510_p5), %v2167_v36, %v853_v44  ;;  %v865_v38 = vld [vmem:[#allocation2 + $0x98] sm:$0xff] (!%p1510_p5) }
 0x170   : > { %v1513_v51 = vmul.f32 (!%p1510_p5), -1.442695, %v2176_v42  ;;  %v1514_v53 = vmul.f32 (!%p1510_p5), -1.442695, %v2179_v43  ;;  %1720 = vpow2.f32 (!%p1510_p5), %v1511_v49  ;;  %v1515_v56 = vmul.f32 (!%p1510_p5), -1.442695, %v2182_v45 }
 0x171   : > { %v729_v6 = vpop.f32.mrb[12].mxu0  ;;  %v769_v7 = vpop.f32.mrb[12].mxu1  ;;  %845 = sbr.rel (%p1510_p5) target bundleno = 458 (0x1ca), region = 119  ;;  %1722 = vpow2.f32 (!%p1510_p5), %v1512_v50  ;;  %v1516_v59 = vmul.f32 (!%p1510_p5), -1.442695, %v2185_v46 }
 0x172   : > { %v790_v10 = vadd.f32 %v729_v6, %v485_v2  ;;  %v806_v11 = vadd.f32 %v769_v7, %v501_v3  ;;  %v731_v12 = vpop.f32.mrb[13].mxu0  ;;  %v771_v13 = vpop.f32.mrb[13].mxu1  ;;  %1724 = vpow2.f32 (!%p1510_p5), %v1513_v51  ;;  %v1517_v62 = vmul.f32 (!%p1510_p5), -1.442695, %v2191_v52 }
 0x173   : > { %v791_v16 = vadd.f32 %v731_v12, %v486_v4  ;;  %v807_v17 = vadd.f32 %v771_v13, %v502_v5  ;;  %v733_v18 = vpop.f32.mrb[14].mxu0  ;;  %v773_v19 = vpop.f32.mrb[14].mxu1  ;;  %v854_v47 = vld [vmem:[#allocation2 + $0x40] sm:$0xff] (!%p1510_p5)  ;;  %1726 = vpow2.f32 (!%p1510_p5), %v1514_v53  ;;  %v1518_v0 = vmul.f32 (!%p1510_p5), -1.442695, %v2195_v54 }
 0x174   : > { %822 = vst [vmem:[#allocation2 + $0x60] sm:$0xff] %v790_v10  ;;  %838 = vst [vmem:[#allocation2 + $0xe0] sm:$0xff] %v806_v11  ;;  %v792_v20 = vadd.f32 %v733_v18, %v487_v8  ;;  %v808_v21 = vadd.f32 %v773_v19, %v503_v9  ;;  %v735_v22 = vpop.f32.mrb[15].mxu0  ;;  %v775_v23 = vpop.f32.mrb[15].mxu1  ;;  %v855_v48 = vld [vmem:[#allocation2 + $0x48] sm:$0xff] (!%p1510_p5)  ;;  %v2199_v57 = vadd.f32 (!%p1510_p5), %v2165_v35, %v854_v47  ;;  %1728 = vpow2.f32 (!%p1510_p5), %v1515_v56  ;;  %v866_v53 = vld [vmem:[#allocation2 + $0xa0] sm:$0xff] (!%p1510_p5) }
 0x175   : > { %823 = vst [vmem:[#allocation2 + $0x68] sm:$0xff] %v791_v16  ;;  %839 = vst [vmem:[#allocation2 + $0xe8] sm:$0xff] %v807_v17  ;;  %v793_v24 = vadd.f32 %v735_v22, %v488_v14  ;;  %v809_v25 = vadd.f32 %v775_v23, %v504_v15  ;;  %v856_v55 = vld [vmem:[#allocation2 + $0x50] sm:$0xff] (!%p1510_p5)  ;;  %v2203_v60 = vadd.f32 (!%p1510_p5), %v2167_v36, %v855_v48  ;;  %1730 = vpow2.f32 (!%p1510_p5), %v1516_v59 }
 0x176   : > { %824 = vst [vmem:[#allocation2 + $0x70] sm:$0xff] %v792_v20  ;;  %840 = vst [vmem:[#allocation2 + $0xf0] sm:$0xff] %v808_v21  ;;  %v857_v58 = vld [vmem:[#allocation2 + $0x58] sm:$0xff] (!%p1510_p5)  ;;  %v2207_v63 = vadd.f32 (!%p1510_p5), %v2165_v35, %v856_v55  ;;  %v1519_v2 = vmul.f32 (!%p1510_p5), -1.442695, %v2199_v57  ;;  %1732 = vpow2.f32 (!%p1510_p5), %v1517_v62  ;;  %v2231_v47 = vadd.f32 (!%p1510_p5), %v2165_v35, %v862_v27 }
 0x177   : > { %825 = vst [vmem:[#allocation2 + $0x78] sm:$0xff] %v793_v24  ;;  %841 = vst [vmem:[#allocation2 + $0xf8] sm:$0xff] %v809_v25  ;;  %v2211_v1 = vadd.f32 (!%p1510_p5), %v2167_v36, %v857_v58  ;;  %v1520_v4 = vmul.f32 (!%p1510_p5), -1.442695, %v2203_v60  ;;  %1734 = vpow2.f32 (!%p1510_p5), %v1518_v0  ;;  %v2235_v51 = vadd.f32 (!%p1510_p5), %v2167_v36, %v863_v30 }
 0x178   : > { %v1521_v5 = vmul.f32 -1.442695, %v2207_v63  ;;  %1736 = vpow2.f32 %v1519_v2  ;;  %v2238_v58 = vadd.f32 %v2165_v35, %v864_v37  ;;  %v2241_v59 = vadd.f32 %v2167_v36, %v865_v38 }
 0x179   : > { %v1522_v6 = vmul.f32 -1.442695, %v2211_v1  ;;  %1738 = vpow2.f32 %v1520_v4 }
 0x17a   : > { %v1721_v8 = vpop.eup %1720  ;;  %1740 = vpow2.f32 %v1521_v5 }
 0x17b   : > { %v858_v61 = vld [vmem:[#allocation2 + $0x60] sm:$0xff]  ;;  %v1723_v9 = vpop.eup %1722  ;;  %v1018_v10 = vadd.f32 1.0, %v1721_v8  ;;  %1742 = vpow2.f32 %v1522_v6  ;;  %v2248_v8 = vadd.f32 %v2165_v35, %v866_v53 }
 0x17c   : > { %v2215_v3 = vadd.f32 %v2165_v35, %v858_v61  ;;  %v1725_v11 = vpop.eup %1724  ;;  %v1019_v12 = vadd.f32 1.0, %v1723_v9  ;;  %v859_v17 = vld [vmem:[#allocation2 + $0x68] sm:$0xff]  ;;  %v868_v9 = vld [vmem:[#allocation2 + $0xb0] sm:$0xff] }
 0x17d   : > { %v1727_v13 = vpop.eup %1726  ;;  %v1020_v14 = vadd.f32 1.0, %v1725_v11  ;;  %v860_v22 = vld [vmem:[#allocation2 + $0x70] sm:$0xff]  ;;  %v2222_v26 = vadd.f32 %v2167_v36, %v859_v17  ;;  %v867_v61 = vld [vmem:[#allocation2 + $0xa8] sm:$0xff]  ;;  %v1530_v17 = vmul.f32 -1.442695, %v2241_v59 }
 0x17e   : > { %v1523_v7 = vmul.f32 -1.442695, %v2215_v3  ;;  %v1729_v15 = vpop.eup %1728  ;;  %v1021_v16 = vadd.f32 1.0, %v1727_v13  ;;  %v861_v23 = vld [vmem:[#allocation2 + $0x78] sm:$0xff]  ;;  %v2225_v33 = vadd.f32 %v2165_v35, %v860_v22  ;;  %v2253_v13 = vadd.f32 %v2167_v36, %v867_v61  ;;  %v871_v22 = vld [vmem:[#allocation2 + $0xc8] sm:$0xff] }
 0x17f   : > { %v1731_v18 = vpop.eup %1730  ;;  %v1022_v19 = vadd.f32 1.0, %v1729_v15  ;;  %v2228_v34 = vadd.f32 %v2167_v36, %v861_v23  ;;  %v1524_v50 = vmul.f32 -1.442695, %v2222_v26 }
 0x180   : > { %1744 = vpow2.f32 %v1523_v7  ;;  %v1733_v20 = vpop.eup %1732  ;;  %v1023_v21 = vadd.f32 1.0, %v1731_v18  ;;  %v1525_v2 = vmul.f32 -1.442695, %v2225_v33  ;;  %v1527_v7 = vmul.f32 -1.442695, %v2231_v47  ;;  %v870_v18 = vld [vmem:[#allocation2 + $0xc0] sm:$0xff] }
 0x181   : > { %1746 = vrcp.f32 %v1018_v10  ;;  %v1735_v24 = vpop.eup %1734  ;;  %v1024_v25 = vadd.f32 1.0, %v1733_v20  ;;  %v1526_v4 = vmul.f32 -1.442695, %v2228_v34 }
 0x182   : > { %1748 = vrcp.f32 %v1019_v12  ;;  %v1737_v28 = vpop.eup %1736  ;;  %v1025_v29 = vadd.f32 1.0, %v1735_v24  ;;  %v1528_v12 = vmul.f32 -1.442695, %v2235_v51 }
 0x183   : > { %1750 = vrcp.f32 %v1020_v14  ;;  %v1739_v31 = vpop.eup %1738  ;;  %v1026_v32 = vadd.f32 1.0, %v1737_v28  ;;  %v869_v14 = vld [vmem:[#allocation2 + $0xb8] sm:$0xff] }
 0x184   : > { %1752 = vrcp.f32 %v1021_v16  ;;  %v1741_v39 = vpop.eup %1740  ;;  %v1027_v44 = vadd.f32 1.0, %v1739_v31  ;;  %v1529_v16 = vmul.f32 -1.442695, %v2238_v58  ;;  %v1532_v31 = vmul.f32 -1.442695, %v2253_v13 }
 0x185   : > { %1754 = vrcp.f32 %v1022_v19  ;;  %v1743_v48 = vpop.eup %1742  ;;  %v1028_v49 = vadd.f32 1.0, %v1741_v39 }
 0x186   : > { %1756 = vrcp.f32 %v1023_v21  ;;  %v1029_v56 = vadd.f32 1.0, %v1743_v48  ;;  %v2260_v21 = vadd.f32 %v2165_v35, %v868_v9 }
 0x187   : > { %1758 = vrcp.f32 %v1024_v25  ;;  %v2265_v25 = vadd.f32 %v2167_v36, %v869_v14 }
 0x188   : > { %1760 = vrcp.f32 %v1025_v29  ;;  %v2270_v29 = vadd.f32 %v2165_v35, %v870_v18 }
 0x189   : > { %1762 = vrcp.f32 %v1026_v32  ;;  %v2275_v32 = vadd.f32 %v2167_v36, %v871_v22 }
 0x18a   : > { %v1745_v55 = vpop.eup %1744  ;;  %1764 = vrcp.f32 %v1027_v44 }
 0x18b   : > { %v1747_v62 = vpop.eup %1746  ;;  %1766 = vrcp.f32 %v1028_v49  ;;  %v1030_v0 = vadd.f32 1.0, %v1745_v55  ;;  %v1535_v55 = vmul.f32 -1.442695, %v2270_v29 }
 0x18c   : > { %v1749_v5 = vpop.eup %1748  ;;  %v1114_v6 = vmul.f32 %v1747_v62, %v2170_v40  ;;  %1768 = vrcp.f32 %v1029_v56 }
 0x18d   : > { %v1751_v10 = vpop.eup %1750  ;;  %v1115_v11 = vmul.f32 %v1749_v5, %v2173_v41  ;;  %1770 = vpow2.f32 %v1524_v50 }
 0x18e   : > { %v1753_v15 = vpop.eup %1752  ;;  %v1116_v40 = vmul.f32 %v1751_v10, %v2176_v42  ;;  %1772 = vrcp.f32 %v1030_v0  ;;  %v1531_v42 = vmul.f32 -1.442695, %v2248_v8  ;;  %v1536_v0 = vmul.f32 -1.442695, %v2275_v32  ;;  %v872_v10 = vld [vmem:[#allocation2 + $0xd0] sm:$0xff] }
 0x18f   : > { %v1755_v19 = vpop.eup %1754  ;;  %v1564_v20 = vpack.c.bf16 %v1115_v11, %v1114_v6  ;;  %v1117_v41 = vmul.f32 %v1753_v15, %v2179_v43  ;;  %1774 = vpow2.f32 %v1525_v2 }
 0x190   : > { %v1757_v23 = vpop.eup %1756  ;;  %v1118_v24 = vmul.f32 %v1755_v19, %v2182_v45  ;;  %1776 = vpow2.f32 %v1526_v4 }
 0x191   : > { %v1759_v27 = vpop.eup %1758  ;;  %1242 = vst [vmem:[%s2124_s1] sm:$0xff] %v1564_v20  ;;  %v1565_v28 = vpack.c.bf16 %v1117_v41, %v1116_v40  ;;  %v1119_v43 = vmul.f32 %v1757_v23, %v2185_v46  ;;  %1778 = vpow2.f32 %v1527_v7  ;;  %v1533_v46 = vmul.f32 -1.442695, %v2260_v21  ;;  %v874_v20 = vld [vmem:[#allocation2 + $0xe0] sm:$0xff]  ;;  %v875_v23 = vld [vmem:[#allocation2 + $0xe8] sm:$0xff] }
 0x192   : > { %v1761_v30 = vpop.eup %1760  ;;  %v1120_v45 = vmul.f32 %v1759_v27, %v2191_v52  ;;  %1780 = vpow2.f32 %v1528_v12  ;;  %v1534_v52 = vmul.f32 -1.442695, %v2265_v25 }
 0x193   : > { %v1763_v37 = vpop.eup %1762  ;;  %1243 = vst [vmem:[%s2124_s1 + $0x8] sm:$0xff] %v1565_v28  ;;  %v1566_v38 = vpack.c.bf16 %v1119_v43, %v1118_v24  ;;  %v1121_v39 = vmul.f32 %v1761_v30, %v2195_v54  ;;  %1782 = vpow2.f32 %v1529_v16  ;;  %v873_v16 = vld [vmem:[#allocation2 + $0xd8] sm:$0xff]  ;;  %v876_v28 = vld [vmem:[#allocation2 + $0xf0] sm:$0xff] }
 0x194   : > { %v1765_v44 = vpop.eup %1764  ;;  %v1122_v48 = vmul.f32 %v1763_v37, %v2199_v57  ;;  %1784 = vpow2.f32 %v1530_v17  ;;  %v2292_v17 = vadd.f32 %v2165_v35, %v872_v10  ;;  %v2295_v27 = vadd.f32 %v2167_v36, %v873_v16  ;;  %v877_v37 = vld [vmem:[#allocation2 + $0xf8] sm:$0xff] }
 0x195   : > { %v1767_v49 = vpop.eup %1766  ;;  %1244 = vst [vmem:[%s2124_s1 + $0x10] sm:$0xff] %v1566_v38  ;;  %v1567_v50 = vpack.c.bf16 %v1121_v39, %v1120_v45  ;;  %v1123_v53 = vmul.f32 %v1765_v44, %v2203_v60  ;;  %1786 = vpow2.f32 %v1531_v42  ;;  %v2303_v44 = vadd.f32 %v2167_v36, %v875_v23 }
 0x196   : > { %v1769_v54 = vpop.eup %1768  ;;  %v1124_v56 = vmul.f32 %v1767_v49, %v2207_v63  ;;  %1788 = vpow2.f32 %v1532_v31  ;;  %v1537_v45 = vmul.f32 -1.442695, %v2292_v17  ;;  %v2299_v31 = vadd.f32 %v2165_v35, %v874_v20 }
 0x197   : > { %v1771_v61 = vpop.eup %1770  ;;  %1245 = vst [vmem:[%s2124_s1 + $0x18] sm:$0xff] %v1567_v50  ;;  %v1568_v57 = vpack.c.bf16 %v1123_v53, %v1122_v48  ;;  %v1125_v62 = vmul.f32 %v1769_v54, %v2211_v1  ;;  %1790 = vpow2.f32 %v1533_v46  ;;  %v2306_v49 = vadd.f32 %v2165_v35, %v876_v28 }
 0x198   : > { %v1773_v2 = vpop.eup %1772  ;;  %v1031_v4 = vadd.f32 1.0, %v1771_v61  ;;  %1792 = vpow2.f32 %v1534_v52  ;;  %v1539_v61 = vmul.f32 -1.442695, %v2299_v31 }
 0x199   : > { %v1775_v60 = vpop.eup %1774  ;;  %1246 = vst [vmem:[%s2124_s1 + $0x20] sm:$0xff] %v1568_v57  ;;  %v1569_v5 = vpack.c.bf16 %v1125_v62, %v1124_v56  ;;  %1794 = vpow2.f32 %v1535_v55  ;;  %v1126_v39 = vmul.f32 %v1773_v2, %v2215_v3  ;;  %v1538_v55 = vmul.f32 -1.442695, %v2295_v27 }
 0x19a   : > { %v1777_v6 = vpop.eup %1776  ;;  %1796 = vrcp.f32 %v1031_v4  ;;  %v1032_v63 = vadd.f32 1.0, %v1775_v60  ;;  %v2311_v3 = vadd.f32 %v2167_v36, %v877_v37  ;;  %v1541_v36 = vmul.f32 -1.442695, %v2306_v49 }
 0x19b   : > { %v1779_v7 = vpop.eup %1778  ;;  %1247 = vst [vmem:[%s2124_s1 + $0x28] sm:$0xff] %v1569_v5  ;;  %v1033_v9 = vadd.f32 1.0, %v1777_v6  ;;  %1798 = vpow2.f32 %v1536_v0  ;;  %v1540_v0 = vmul.f32 -1.442695, %v2303_v44 }
 0x19c   : > { %v1781_v11 = vpop.eup %1780  ;;  %1800 = vrcp.f32 %v1032_v63  ;;  %v1034_v1 = vadd.f32 1.0, %v1779_v7  ;;  %v1542_v5 = vmul.f32 -1.442695, %v2311_v3 }
 0x19d   : > { %v1783_v12 = vpop.eup %1782  ;;  %1802 = vrcp.f32 %v1033_v9  ;;  %v1035_v14 = vadd.f32 1.0, %v1781_v11 }
 0x19e   : > { %v1785_v15 = vpop.eup %1784  ;;  %1804 = vrcp.f32 %v1034_v1  ;;  %v1036_v40 = vadd.f32 1.0, %v1783_v12 }
 0x19f   : > { %v1787_v18 = vpop.eup %1786  ;;  %1806 = vrcp.f32 %v1035_v14  ;;  %v1037_v19 = vadd.f32 1.0, %v1785_v15 }
 0x1a0   : > { %v1789_v41 = vpop.eup %1788  ;;  %1808 = vrcp.f32 %v1036_v40  ;;  %v1038_v22 = vadd.f32 1.0, %v1787_v18 }
 0x1a1   : > { %v1791_v24 = vpop.eup %1790  ;;  %1810 = vrcp.f32 %v1037_v19  ;;  %v1039_v42 = vadd.f32 1.0, %v1789_v41 }
 0x1a2   : > { %v1793_v43 = vpop.eup %1792  ;;  %1812 = vrcp.f32 %v1038_v22  ;;  %v1040_v30 = vadd.f32 1.0, %v1791_v24 }
 0x1a3   : > { %v1795_v38 = vpop.eup %1794  ;;  %1814 = vrcp.f32 %v1039_v42  ;;  %v1041_v46 = vadd.f32 1.0, %v1793_v43 }
 0x1a4   : > { %v1797_v48 = vpop.eup %1796  ;;  %1816 = vrcp.f32 %v1040_v30  ;;  %v1042_v52 = vadd.f32 1.0, %v1795_v38 }
 0x1a5   : > { %v1799_v50 = vpop.eup %1798  ;;  %v1127_v53 = vmul.f32 %v1797_v48, %v2222_v26  ;;  %1818 = vrcp.f32 %v1041_v46 }
 0x1a6   : > { %v1801_v54 = vpop.eup %1800  ;;  %v1043_v56 = vadd.f32 1.0, %v1799_v50  ;;  %1820 = vrcp.f32 %v1042_v52 }
 0x1a7   : > { %v1803_v57 = vpop.eup %1802  ;;  %v1570_v62 = vpack.c.bf16 %v1127_v53, %v1126_v39  ;;  %v1128_v35 = vmul.f32 %v1801_v54, %v2225_v33  ;;  %1822 = vpow2.f32 %v1537_v45 }
 0x1a8   : > { %v1805_v26 = vpop.eup %1804  ;;  %v1129_v2 = vmul.f32 %v1803_v57, %v2228_v34  ;;  %1824 = vrcp.f32 %v1043_v56 }
 0x1a9   : > { %v1807_v4 = vpop.eup %1806  ;;  %1248 = vst [vmem:[%s2124_s1 + $0x30] sm:$0xff] %v1570_v62  ;;  %v1130_v60 = vmul.f32 %v1805_v26, %v2231_v47  ;;  %1826 = vpow2.f32 %v1538_v55 }
 0x1aa   : > { %v1809_v6 = vpop.eup %1808  ;;  %v1571_v33 = vpack.c.bf16 %v1129_v2, %v1128_v35  ;;  %v1131_v63 = vmul.f32 %v1807_v4, %v2235_v51  ;;  %1828 = vpow2.f32 %v1539_v61 }
 0x1ab   : > { %v1811_v7 = vpop.eup %1810  ;;  %v1132_v34 = vmul.f32 %v1809_v6, %v2238_v58  ;;  %1830 = vpow2.f32 %v1540_v0 }
 0x1ac   : > { %v1813_v9 = vpop.eup %1812  ;;  %1249 = vst [vmem:[%s2124_s1 + $0x38] sm:$0xff] %v1571_v33  ;;  %v1572_v10 = vpack.c.bf16 %v1131_v63, %v1130_v60  ;;  %v1133_v11 = vmul.f32 %v1811_v7, %v2241_v59  ;;  %1832 = vpow2.f32 %v1541_v36 }
 0x1ad   : > { %v1815_v47 = vpop.eup %1814  ;;  %v1134_v1 = vmul.f32 %v1813_v9, %v2248_v8  ;;  %1834 = vpow2.f32 %v1542_v5 }
 0x1ae   : > { %v1817_v12 = vpop.eup %1816  ;;  %1250 = vst [vmem:[%s2124_s1 + $0x40] sm:$0xff] %v1572_v10  ;;  %v1573_v51 = vpack.c.bf16 %v1133_v11, %v1132_v34  ;;  %v1135_v14 = vmul.f32 %v1815_v47, %v2253_v13 }
 0x1af   : > { %v1819_v58 = vpop.eup %1818  ;;  %v1136_v15 = vmul.f32 %v1817_v12, %v2260_v21 }
 0x1b0   : > { %v1821_v40 = vpop.eup %1820  ;;  %1251 = vst [vmem:[%s2124_s1 + $0x48] sm:$0xff] %v1573_v51  ;;  %v1574_v16 = vpack.c.bf16 %v1135_v14, %v1134_v1  ;;  %v1137_v59 = vmul.f32 %v1819_v58, %v2265_v25 }
 0x1b1   : > { %v1823_v18 = vpop.eup %1822  ;;  %v1138_v19 = vmul.f32 %v1821_v40, %v2270_v29 }
 0x1b2   : > { %v1825_v20 = vpop.eup %1824  ;;  %1252 = vst [vmem:[%s2124_s1 + $0x50] sm:$0xff] %v1574_v16  ;;  %v1575_v8 = vpack.c.bf16 %v1137_v59, %v1136_v15  ;;  %v1044_v41 = vadd.f32 1.0, %v1823_v18 }
 0x1b3   : > { %v1827_v22 = vpop.eup %1826  ;;  %v1139_v13 = vmul.f32 %v1825_v20, %v2275_v32 }
 0x1b4   : > { %v1829_v23 = vpop.eup %1828  ;;  %1253 = vst [vmem:[%s2124_s1 + $0x58] sm:$0xff] %v1575_v8  ;;  %v1045_v24 = vadd.f32 1.0, %v1827_v22  ;;  %1836 = vrcp.f32 %v1044_v41 }
 0x1b5   : > { %v1831_v21 = vpop.eup %1830  ;;  %v1576_v42 = vpack.c.bf16 %v1139_v13, %v1138_v19  ;;  %v1046_v28 = vadd.f32 1.0, %v1829_v23 }
 0x1b6   : > { %v1833_v43 = vpop.eup %1832  ;;  %1838 = vrcp.f32 %v1045_v24  ;;  %v1047_v25 = vadd.f32 1.0, %v1831_v21 }
 0x1b7   : > { %v1835_v30 = vpop.eup %1834  ;;  %1254 = vst [vmem:[%s2124_s1 + $0x60] sm:$0xff] %v1576_v42  ;;  %1840 = vrcp.f32 %v1046_v28  ;;  %v1048_v29 = vadd.f32 1.0, %v1833_v43 }
 0x1b8   : > { %1842 = vrcp.f32 %v1047_v25  ;;  %v1049_v45 = vadd.f32 1.0, %v1835_v30 }
 0x1b9   : > { %1844 = vrcp.f32 %v1048_v29 }
 0x1ba   : > { %1846 = vrcp.f32 %v1049_v45 }
 0x1be   : > { %v1837_v32 = vpop.eup %1836 }
 0x1bf   : > { %v1140_v37 = vmul.f32 %v1837_v32, %v2292_v17 }
 0x1c0   : > { %v1839_v38 = vpop.eup %1838 }
 0x1c1   : > { %v1841_v39 = vpop.eup %1840  ;;  %v1141_v46 = vmul.f32 %v1839_v38, %v2295_v27 }
 0x1c2   : > { %v1843_v48 = vpop.eup %1842  ;;  %v1142_v52 = vmul.f32 %v1841_v39, %v2299_v31 }
 0x1c3   : > { %v1845_v50 = vpop.eup %1844  ;;  %v1577_v53 = vpack.c.bf16 %v1141_v46, %v1140_v37  ;;  %v1143_v55 = vmul.f32 %v1843_v48, %v2303_v44 }
 0x1c4   : > { %v1847_v54 = vpop.eup %1846  ;;  %v1144_v56 = vmul.f32 %v1845_v50, %v2306_v49 }
 0x1c5   : > { %1255 = vst [vmem:[%s2124_s1 + $0x68] sm:$0xff] %v1577_v53  ;;  %v1578_v61 = vpack.c.bf16 %v1143_v55, %v1142_v52  ;;  %v1145_v57 = vmul.f32 %v1847_v54, %v2311_v3 }
 0x1c7   : > { %1256 = vst [vmem:[%s2124_s1 + $0x70] sm:$0xff] %v1578_v61  ;;  %v1579_v17 = vpack.c.bf16 %v1145_v57, %v1144_v56 }
 0x1c9   : > { %1257 = vst [vmem:[%s2124_s1 + $0x78] sm:$0xff] %v1579_v17 }
 0x1ca PF: > { %1264 = sbr.rel (!%p2052_p12) target bundleno = 468 (0x1d4), region = 123  ;;  %s1580_s16 = sshll.u32 (%p2052_p12), %s1922_s19, 3  ;;  %v1328_v27 = vld [vmem:[%s2124_s1] sm:$0xff] (%p2052_p12)  ;;  %v1330_v31 = vld [vmem:[%s2124_s1 + $0x8] sm:$0xff] (%p2052_p12)  ;;  %v1332_v44 = vld [vmem:[%s2124_s1 + $0x10] sm:$0xff] (%p2052_p12) }
 0x1cb   : > { %s1270_s5 = scalar_lea.vmem (%p2052_p12), %s2403_s3, %s1580_s16  ;;  %v1334_v49 = vld [vmem:[%s2124_s1 + $0x18] sm:$0xff] (%p2052_p12)  ;;  %v1336_v3 = vld [vmem:[%s2124_s1 + $0x20] sm:$0xff] (%p2052_p12)  ;;  %v1338_v62 = vld [vmem:[%s2124_s1 + $0x28] sm:$0xff] (%p2052_p12) }
 0x1cc   : > { %1329 = vst [vmem:[%s1270_s5] sm:$0xff] (%p2052_p12), %v1328_v27  ;;  %1331 = vst [vmem:[%s1270_s5 + $0x28] sm:$0xff] (%p2052_p12), %v1330_v31  ;;  %v1340_v35 = vld [vmem:[%s2124_s1 + $0x30] sm:$0xff] (%p2052_p12)  ;;  %v1342_v0 = vld [vmem:[%s2124_s1 + $0x38] sm:$0xff] (%p2052_p12) }
 0x1cd   : > { %1333 = vst [vmem:[%s1270_s5 + $0x50] sm:$0xff] (%p2052_p12), %v1332_v44  ;;  %1335 = vst [vmem:[%s1270_s5 + $0x78] sm:$0xff] (%p2052_p12), %v1334_v49  ;;  %v1344_v26 = vld [vmem:[%s2124_s1 + $0x40] sm:$0xff] (%p2052_p12)  ;;  %v1346_v2 = vld [vmem:[%s2124_s1 + $0x48] sm:$0xff] (%p2052_p12) }
 0x1ce   : > { %1337 = vst [vmem:[%s1270_s5 + $0xa0] sm:$0xff] (%p2052_p12), %v1336_v3  ;;  %1339 = vst [vmem:[%s1270_s5 + $0xc8] sm:$0xff] (%p2052_p12), %v1338_v62  ;;  %v1348_v36 = vld [vmem:[%s2124_s1 + $0x50] sm:$0xff] (%p2052_p12)  ;;  %v1350_v4 = vld [vmem:[%s2124_s1 + $0x58] sm:$0xff] (%p2052_p12) }
 0x1cf   : > { %1341 = vst [vmem:[%s1270_s5 + $0xf0] sm:$0xff] (%p2052_p12), %v1340_v35  ;;  %1343 = vst [vmem:[%s1270_s5 + $0x118] sm:$0xff] (%p2052_p12), %v1342_v0  ;;  %v1352_v60 = vld [vmem:[%s2124_s1 + $0x60] sm:$0xff] (%p2052_p12)  ;;  %v1354_v5 = vld [vmem:[%s2124_s1 + $0x68] sm:$0xff] (%p2052_p12) }
 0x1d0   : > { %1345 = vst [vmem:[%s1270_s5 + $0x140] sm:$0xff] (%p2052_p12), %v1344_v26  ;;  %1347 = vst [vmem:[%s1270_s5 + $0x168] sm:$0xff] (%p2052_p12), %v1346_v2  ;;  %v1356_v6 = vld [vmem:[%s2124_s1 + $0x70] sm:$0xff] (%p2052_p12)  ;;  %v1358_v33 = vld [vmem:[%s2124_s1 + $0x78] sm:$0xff] (%p2052_p12) }
 0x1d1   : > { %1349 = vst [vmem:[%s1270_s5 + $0x190] sm:$0xff] %v1348_v36  ;;  %1351 = vst [vmem:[%s1270_s5 + $0x1b8] sm:$0xff] %v1350_v4 }
 0x1d2   : > { %1353 = vst [vmem:[%s1270_s5 + $0x1e0] sm:$0xff] %v1352_v60  ;;  %1355 = vst [vmem:[%s1270_s5 + $0x208] sm:$0xff] %v1354_v5 }
 0x1d3   : > { %1357 = vst [vmem:[%s1270_s5 + $0x230] sm:$0xff] %v1356_v6  ;;  %1359 = vst [vmem:[%s1270_s5 + $0x258] sm:$0xff] %v1358_v33 }
 0x1d4 PF: > { %s13_s22 = sadd.s32 1, %s1934_s22   ;;  %s2413_s10 = sld [smem:[#allocation6_spill]] }
 0x1d5   : > { %p10_p6 = scmp.ge.s32.totalorder %s13_s22, 17   ;;  %s2414_s12 = smov %s1898_s13 }
 0x1d6   : > { %s2415_s13 = smov %s2050_s9  ;;  %s2416_s14 = smov %s1906_s15 }
 0x1d7   : > { %s2417_s15 = smov %s2047_s8  ;;  %s2418_s16 = smov %s1914_s17 }
 0x1d8   : > { %s2419_s17 = smov %s2033_s30  ;;  %s2420_s18 = smov %s1926_s20 }
 0x1d9   : > { %s2421_s19 = smov %s1930_s21  ;;  %s2422_s20 = smov %s2425_s24 }
 0x1da   : > { %s2423_s21 = smov %s2413_s10  ;;  %12 = sbr.rel (!%p10_p6) target bundleno = 9 (0x9), region = 203 }

</bundles_post_ra>
